<compile_context>
chip_gen: v5e
topology: v5e:2x2
jax: 0.10.0
libtpu: 0.0.40
codegen_flags: <defaults>
</compile_context>

<pallas_src>
import functools

import jax
import jax.numpy as jnp
from jax.experimental import pallas as pl
from jax.experimental.pallas import tpu as pltpu


# ---------------------------------------------------------------------------
# Kernel
# ---------------------------------------------------------------------------

def _molgat_kernel(num_heads, head_dim, num_graphs, e_pad,
                   x_ref, ea_ref, s_stk_ref, s_dst_t_ref, g_pool_ref,
                   bidx_ref, inv_deg_ref,
                   w_cat_ref, we_cat_ref, vec_ref, fcw_ref,
                   o_ref):
    f32 = jnp.float32
    bf16 = jnp.bfloat16
    H, D, G, E = num_heads, head_dim, num_graphs, e_pad
    HD = H * D

    x_b = x_ref[...].astype(bf16)
    ea_b = ea_ref[...].astype(bf16)
    s_stk = s_stk_ref[...]              # [2E, N] bf16; rows [:E]=src, [E:]=dst one-hots
    s_src = s_stk[:E]
    s_dst = s_stk[E:]
    s_dst_t = s_dst_t_ref[...]          # [N, E] bf16, shipped (no in-kernel transpose)
    vec = vec_ref[...]                  # [8+G, 2D] packed small parameters

    conv_bias = vec[0:1, :D]
    bn_scale = vec[1:2, :D]
    bn_shift = vec[2:3, :D]
    fc1_b = vec[3:4, :]
    fc2_b = vec[4:5, :]
    fco_row = vec[5:6, :]
    fco_b = vec[6:7, 0:1]
    inv_cnt = vec[8:8 + G, 0:1]         # [G, 1]; 0 for empty graphs

    # ---- MolGATConv: fused per-side linear transforms (bf16 MXU, f32 acc) ----
    xw_full = jnp.dot(x_b, w_cat_ref[...].astype(bf16),
                      preferred_element_type=f32)                 # [N, HD+2H] = [xW | alpha_node]
    xw = xw_full[:, :HD]
    alpha_node = xw_full[:, HD:]                                  # [N, 2H]

    ew_full = jnp.dot(ea_b, we_cat_ref[...].astype(bf16),
                      preferred_element_type=f32)                 # [E, HD+H] = [eWe | alpha_edge]
    ew = ew_full[:, :HD]
    alpha_edge = ew_full[:, HD:]                                  # [E, H]

    # ---- single stacked gather of the narrow node attention terms ----
    g_att = jnp.dot(s_stk, alpha_node.astype(bf16),
                    preferred_element_type=f32)                   # [2E, 2H]
    logits = g_att[:E, :H] + g_att[E:, H:] + alpha_edge           # [E, H]
    logits = jnp.where(logits > 0, logits, 0.2 * logits)          # LeakyReLU(0.2)

    # ---- segment softmax over incoming edges of each destination ----
    # Shift by the per-destination MEAN logit (a valid per-segment constant);
    # at least one exp argument per segment is >= 0 so the denominator never
    # underflows to zero.  exp argument clamped at 80 to stay finite in f32.
    # TODO(synk): exact per-segment max shift needs a blocked two-pass design.
    seg_sum = jnp.dot(s_dst_t, logits.astype(bf16),
                      preferred_element_type=f32)                 # [N, H]
    c_node = (seg_sum * inv_deg_ref[...]).astype(bf16)            # [N, H]
    c_edge = jnp.dot(s_dst, c_node, preferred_element_type=f32)   # [E, H] exact per-edge gather
    p = jnp.exp(jnp.minimum(logits - c_edge, 80.0))               # [E, H]

    # ---- messages + fused (msg | p) scatter-add at destinations ----
    xs = jnp.dot(s_src, xw.astype(bf16), preferred_element_type=f32)   # [E, HD]
    xe = xs + ew                                                        # [E, HD] f32
    parts = [(xe[:, h * D:(h + 1) * D] * p[:, h:h + 1]).astype(bf16)
             for h in range(H)]
    parts.append(p.astype(bf16))
    scat_in = jnp.concatenate(parts, axis=1)                            # [E, HD+H] bf16
    scat = jnp.dot(s_dst_t, scat_in, preferred_element_type=f32)        # [N, HD+H]
    agg = scat[:, :HD]
    denom = scat[:, HD:]                                                # [N, H]

    # per-head normalize + mean over heads (pure VPU; m_mean matmul removed)
    denom_safe = jnp.where(denom > 0, denom, 1.0)
    inv_denom = jnp.where(denom > 0, 1.0 / denom_safe, 0.0)             # exact divide
    h_nodes = agg[:, 0:D] * inv_denom[:, 0:1]
    for hh in range(1, H):
        h_nodes = h_nodes + agg[:, hh * D:(hh + 1) * D] * inv_denom[:, hh:hh + 1]
    h_nodes = h_nodes * jnp.float32(1.0 / H) + conv_bias                # [N, D]

    # ReLU, dropout(eval)=identity, BatchNorm(eval, folded scale/shift)
    h_nodes = jnp.maximum(h_nodes, 0.0)
    h_nodes = h_nodes * bn_scale + bn_shift

    # ---- pooling: cat([global_max_pool, global_mean_pool], dim=1) ----
    gsum = jnp.dot(g_pool_ref[...], h_nodes, preferred_element_type=f32)  # [G, D] (f32 MXU)
    gap = gsum * inv_cnt                                                   # mean pool (exact)
    bidx = bidx_ref[...]                                                   # [N, 1] int32
    max_rows = []
    for g in range(G):                      # G small & static
        mask = bidx == g
        max_rows.append(jnp.max(jnp.where(mask, h_nodes, jnp.float32(-1e30)),
                                axis=0, keepdims=True))
    gmp = jnp.concatenate(max_rows, axis=0)                                # [G, D]
    gmp = jnp.where(inv_cnt > 0, gmp, 0.0)                                 # empty-graph guard
    pooled = jnp.concatenate([gmp, gap], axis=1)                           # [G, 2D]

    # ---- fully connected head (tiny; f32) ----
    h1 = jnp.maximum(jnp.dot(pooled, fcw_ref[0], preferred_element_type=f32) + fc1_b, 0.0)
    h2 = jnp.maximum(jnp.dot(h1, fcw_ref[1], preferred_element_type=f32) + fc2_b, 0.0)
    o_ref[...] = jnp.sum(h2 * fco_row, axis=1, keepdims=True) + fco_b


# ---------------------------------------------------------------------------
# Wrapper (glue: one-hots, parameter folding/packing, pallas_call setup)
# ---------------------------------------------------------------------------

def molgat_forward(params, x, edge_index, batch_index, edge_attr, num_graphs):
    f32 = jnp.float32
    bf16 = jnp.bfloat16
    N, F = x.shape
    E, Fe = edge_attr.shape
    H = params["num_heads"]
    D = params["hidden_dim"]
    HD = H * D
    G = int(num_graphs)
    twoD = 2 * D

    # ---- graph structure as small dense operands -------------------------------
    src, dst = edge_index[0], edge_index[1]
    Ep = ((E + 15) // 16) * 16                     # pad E to the bf16 sublane pack
    if Ep > E:
        pad = Ep - E
        src_p = jnp.concatenate([src, jnp.full((pad,), -1, src.dtype)])
        dst_p = jnp.concatenate([dst, jnp.full((pad,), -1, dst.dtype)])
        ea_p = jnp.concatenate([edge_attr, jnp.zeros((pad, Fe), edge_attr.dtype)], axis=0)
    else:
        src_p, dst_p, ea_p = src, dst, edge_attr
    s_src = jax.nn.one_hot(src_p, N, dtype=bf16)            # [Ep, N] (all-zero rows for pads)
    s_dst = jax.nn.one_hot(dst_p, N, dtype=bf16)            # [Ep, N]
    s_stk = jnp.concatenate([s_src, s_dst], axis=0)         # [2Ep, N]
    s_dst_t = s_dst.T                                       # [N, Ep] pre-transposed scatter
    deg = jnp.zeros((N, 1), f32).at[dst, 0].add(1.0)        # in-degree per node
    inv_deg = 1.0 / jnp.maximum(deg, 1.0)                   # [N, 1]
    bidx = batch_index.astype(jnp.int32)[:, None]           # [N, 1]
    g_pool = jax.nn.one_hot(batch_index, G, dtype=f32).T    # [G, N]
    cnt = jnp.sum(g_pool, axis=1, keepdims=True)            # [G, 1]
    inv_cnt = jnp.where(cnt > 0, 1.0 / jnp.maximum(cnt, 1.0), 0.0)

    # ---- fold / pack parameters -------------------------------------------------
    eye_h = jnp.eye(H, dtype=f32)

    def blockdiag(att):   # [H, D] -> [HD, H]
        return (att[:, :, None] * eye_h[:, None, :]).reshape(HD, H)

    a_cat = jnp.concatenate([blockdiag(params["att_src"]),
                             blockdiag(params["att_dst"])], axis=1)        # [HD, 2H]
    w_cat = jnp.concatenate([params["W"], params["W"] @ a_cat], axis=1)    # [F, HD+2H]
    we_cat = jnp.concatenate(
        [params["We"], params["We"] @ blockdiag(params["att_edge"])], axis=1)  # [Fe, HD+H]
    bn_scale = params["bn_gamma"] * jax.lax.rsqrt(params["bn_rvar"] + 1e-5)
    bn_shift = params["bn_beta"] - params["bn_rmean"] * bn_scale

    def row(v):           # pad a [r, k] row-block to [r, 2D]
        return jnp.pad(v.astype(f32), ((0, 0), (0, twoD - v.shape[1])))

    vec_pack = jnp.concatenate(
        [row(params["conv_bias"]), row(bn_scale), row(bn_shift),
         row(params["fc1_b"]), row(params["fc2_b"]), row(params["fco_w"].T),
         row(params["fco_b"]), jnp.zeros((1, twoD), f32),
         row(inv_cnt)], axis=0)                                            # [8+G, 2D]
    fcw = jnp.stack([params["fc1_w"], params["fc2_w"]], axis=0)            # [2, 2D, 2D]

    inputs = (x, ea_p, s_stk, s_dst_t, g_pool, bidx, inv_deg,
              w_cat, we_cat, vec_pack, fcw)

    # ---- cost estimate + VMEM plan ----------------------------------------------
    flops = 2 * (N * F * (HD + 2 * H) + Ep * Fe * (HD + H)
                 + 2 * Ep * N * 2 * H + N * Ep * H + Ep * N * H
                 + Ep * N * HD + N * Ep * (HD + H)
                 + G * N * D + 2 * G * twoD * twoD + G * twoD)
    transcendentals = Ep * H + N * H + G
    operand_bytes = sum(int(a.size) * a.dtype.itemsize for a in inputs)
    interm_bytes = (4 * (N * (HD + 2 * H) + Ep * (HD + H) + 2 * Ep * 2 * H
                         + 3 * Ep * H + 2 * N * H + 2 * Ep * HD
                         + N * (HD + H) + 2 * N * D + 3 * G * twoD)
                    + 2 * Ep * (HD + H))
    footprint = operand_bytes + interm_bytes + G * 4
    vmem_limit = int(min(48 * 1024 * 1024, max(16 * 1024 * 1024, 2 * footprint)))

    vmem_spec = pl.BlockSpec(memory_space=pltpu.MemorySpace.VMEM)
    return pl.pallas_call(
        functools.partial(_molgat_kernel, H, D, G, Ep),
        out_shape=jax.ShapeDtypeStruct((G, 1), f32),
        in_specs=[vmem_spec] * len(inputs),
        out_specs=vmem_spec,
        compiler_params=pltpu.CompilerParams(vmem_limit_bytes=vmem_limit),
        cost_estimate=pl.CostEstimate(flops=int(flops),
                                      transcendentals=int(transcendentals),
                                      bytes_accessed=int(operand_bytes + G * 4)),
    )(*inputs)


# ---------------------------------------------------------------------------
# Deterministic parameter init + example inputs
# ---------------------------------------------------------------------------

def init_params(key, node_features, hidden_dim, edge_features, num_heads):
    HD = num_heads * hidden_dim
    ks = jax.random.split(key, 12)
    nrm = lambda k, s: (0.1 * jax.random.normal(k, s)).astype(jnp.float32)
    return {
        "num_heads": num_heads,
        "hidden_dim": hidden_dim,
        # MolGATConv layer 0
        "W": nrm(ks[0], (node_features, HD)),
        "We": nrm(ks[1], (edge_features, HD)),
        "att_src": nrm(ks[2], (num_heads, hidden_dim)),
        "att_dst": nrm(ks[3], (num_heads, hidden_dim)),
        "att_edge": nrm(ks[4], (num_heads, hidden_dim)),
        "conv_bias": nrm(ks[5], (1, hidden_dim)),
        # BatchNorm(hidden_dim) — eval mode running stats
        "bn_gamma": jnp.ones((1, hidden_dim), jnp.float32),
        "bn_beta": jnp.zeros((1, hidden_dim), jnp.float32),
        "bn_rmean": jnp.zeros((1, hidden_dim), jnp.float32),
        "bn_rvar": jnp.ones((1, hidden_dim), jnp.float32),
        # fc_list (num_fc_layers - 1 = 2 layers) + fc_out
        "fc1_w": nrm(ks[6], (2 * hidden_dim, 2 * hidden_dim)),
        "fc1_b": nrm(ks[7], (1, 2 * hidden_dim)),
        "fc2_w": nrm(ks[8], (2 * hidden_dim, 2 * hidden_dim)),
        "fc2_b": nrm(ks[9], (1, 2 * hidden_dim)),
        "fco_w": nrm(ks[10], (2 * hidden_dim, 1)),
        "fco_b": nrm(ks[11], (1, 1)),
    }


if __name__ == "__main__":
    # MolGAT(node_features=16, hidden_dim=32, edge_features=8, num_heads=4,
    #        dropout=0.2, num_conv_layers=3, num_fc_layers=3), eval mode.
    node_features, hidden_dim, edge_features = 16, 32, 8
    num_heads = 4

    # Small batched graph: 3 graphs of 8 nodes, bidirectional ring edges.
    num_graphs, nodes_per_graph = 3, 8
    N = num_graphs * nodes_per_graph
    src_list, dst_list, batch_list = [], [], []
    for g in range(num_graphs):
        base = g * nodes_per_graph
        for i in range(nodes_per_graph):
            j = (i + 1) % nodes_per_graph
            src_list += [base + i, base + j]
            dst_list += [base + j, base + i]
        batch_list += [g] * nodes_per_graph
    E = len(src_list)

    edge_index = jnp.array([src_list, dst_list], dtype=jnp.int32)   # [2, E]
    batch_index = jnp.array(batch_list, dtype=jnp.int32)            # [N]

    key = jax.random.PRNGKey(0)
    kx, ke, kp = jax.random.split(key, 3)
    x = jax.random.normal(kx, (N, node_features), dtype=jnp.float32)
    edge_attr = jax.random.normal(ke, (E, edge_features), dtype=jnp.float32)
    params = init_params(kp, node_features, hidden_dim, edge_features, num_heads)

    out = molgat_forward(params, x, edge_index, batch_index, edge_attr, num_graphs)
    out = jax.block_until_ready(out)
    assert out.shape == (num_graphs, 1) and bool(jnp.all(jnp.isfinite(out)))
    print("KERNEL_OK")
</pallas_src>

<mosaic_0001>
module attributes {stable_mosaic.version = 11 : i64} {
  func.func @_molgat_kernel(%arg0: memref<24x16xf32, #tpu.memory_space<vmem>>, %arg1: memref<48x8xf32, #tpu.memory_space<vmem>>, %arg2: memref<96x24xbf16, #tpu.memory_space<vmem>>, %arg3: memref<24x48xbf16, #tpu.memory_space<vmem>>, %arg4: memref<3x24xf32, #tpu.memory_space<vmem>>, %arg5: memref<24x1xi32, #tpu.memory_space<vmem>>, %arg6: memref<24x1xf32, #tpu.memory_space<vmem>>, %arg7: memref<16x136xf32, #tpu.memory_space<vmem>>, %arg8: memref<8x132xf32, #tpu.memory_space<vmem>>, %arg9: memref<11x64xf32, #tpu.memory_space<vmem>>, %arg10: memref<2x64x64xf32, #tpu.memory_space<vmem>>, %arg11: memref<3x1xf32, #tpu.memory_space<vmem>>) attributes {dimension_semantics = [], scalar_prefetch = 0 : i64, scratch_operands = 0 : i64, tpu.core_type = #tpu.core_type<tc>} {
    %c0 = arith.constant 0 : index
    %c0_0 = arith.constant 0 : index
    %0 = vector.load %arg0[%c0, %c0_0] : memref<24x16xf32, #tpu.memory_space<vmem>>, vector<24x16xf32>
    %1 = arith.truncf %0 : vector<24x16xf32> to vector<24x16xbf16>
    %c0_1 = arith.constant 0 : index
    %c0_2 = arith.constant 0 : index
    %2 = vector.load %arg1[%c0_1, %c0_2] : memref<48x8xf32, #tpu.memory_space<vmem>>, vector<48x8xf32>
    %3 = arith.truncf %2 : vector<48x8xf32> to vector<48x8xbf16>
    %c0_3 = arith.constant 0 : index
    %c0_4 = arith.constant 0 : index
    %4 = vector.load %arg2[%c0_3, %c0_4] : memref<96x24xbf16, #tpu.memory_space<vmem>>, vector<96x24xbf16>
    %5 = vector.extract_strided_slice %4 {offsets = [0, 0], sizes = [48, 24], strides = [1, 1]} : vector<96x24xbf16> to vector<48x24xbf16>
    %6 = vector.extract_strided_slice %4 {offsets = [48, 0], sizes = [48, 24], strides = [1, 1]} : vector<96x24xbf16> to vector<48x24xbf16>
    %c0_5 = arith.constant 0 : index
    %c0_6 = arith.constant 0 : index
    %7 = vector.load %arg3[%c0_5, %c0_6] : memref<24x48xbf16, #tpu.memory_space<vmem>>, vector<24x48xbf16>
    %c0_7 = arith.constant 0 : index
    %c0_8 = arith.constant 0 : index
    %8 = vector.load %arg9[%c0_7, %c0_8] : memref<11x64xf32, #tpu.memory_space<vmem>>, vector<11x64xf32>
    %9 = vector.extract_strided_slice %8 {offsets = [0, 0], sizes = [1, 32], strides = [1, 1]} : vector<11x64xf32> to vector<1x32xf32>
    %10 = vector.extract_strided_slice %8 {offsets = [1, 0], sizes = [1, 32], strides = [1, 1]} : vector<11x64xf32> to vector<1x32xf32>
    %11 = vector.extract_strided_slice %8 {offsets = [2, 0], sizes = [1, 32], strides = [1, 1]} : vector<11x64xf32> to vector<1x32xf32>
    %12 = vector.extract_strided_slice %8 {offsets = [3, 0], sizes = [1, 64], strides = [1, 1]} : vector<11x64xf32> to vector<1x64xf32>
    %13 = vector.extract_strided_slice %8 {offsets = [4, 0], sizes = [1, 64], strides = [1, 1]} : vector<11x64xf32> to vector<1x64xf32>
    %14 = vector.extract_strided_slice %8 {offsets = [5, 0], sizes = [1, 64], strides = [1, 1]} : vector<11x64xf32> to vector<1x64xf32>
    %15 = vector.extract_strided_slice %8 {offsets = [6, 0], sizes = [1, 1], strides = [1, 1]} : vector<11x64xf32> to vector<1x1xf32>
    %16 = vector.extract_strided_slice %8 {offsets = [8, 0], sizes = [3, 1], strides = [1, 1]} : vector<11x64xf32> to vector<3x1xf32>
    %c0_9 = arith.constant 0 : index
    %c0_10 = arith.constant 0 : index
    %17 = vector.load %arg7[%c0_9, %c0_10] : memref<16x136xf32, #tpu.memory_space<vmem>>, vector<16x136xf32>
    %18 = arith.truncf %17 : vector<16x136xf32> to vector<16x136xbf16>
    %cst = arith.constant dense<0.000000e+00> : vector<24x136xf32>
    %19 = tpu.matmul %1, %18, %cst {dimension_numbers = #tpu.dot_dimension_numbers<[1], [0], [0], [1], [0, 0, 1, 1], [], []>} : vector<24x16xbf16>, vector<16x136xbf16>, vector<24x136xf32> -> vector<24x136xf32>
    %20 = vector.extract_strided_slice %19 {offsets = [0, 0], sizes = [24, 128], strides = [1, 1]} : vector<24x136xf32> to vector<24x128xf32>
    %21 = vector.extract_strided_slice %19 {offsets = [0, 128], sizes = [24, 8], strides = [1, 1]} : vector<24x136xf32> to vector<24x8xf32>
    %c0_11 = arith.constant 0 : index
    %c0_12 = arith.constant 0 : index
    %22 = vector.load %arg8[%c0_11, %c0_12] : memref<8x132xf32, #tpu.memory_space<vmem>>, vector<8x132xf32>
    %23 = arith.truncf %22 : vector<8x132xf32> to vector<8x132xbf16>
    %cst_13 = arith.constant dense<0.000000e+00> : vector<48x132xf32>
    %24 = tpu.matmul %3, %23, %cst_13 {dimension_numbers = #tpu.dot_dimension_numbers<[1], [0], [0], [1], [0, 0, 1, 1], [], []>} : vector<48x8xbf16>, vector<8x132xbf16>, vector<48x132xf32> -> vector<48x132xf32>
    %25 = vector.extract_strided_slice %24 {offsets = [0, 0], sizes = [48, 128], strides = [1, 1]} : vector<48x132xf32> to vector<48x128xf32>
    %26 = vector.extract_strided_slice %24 {offsets = [0, 128], sizes = [48, 4], strides = [1, 1]} : vector<48x132xf32> to vector<48x4xf32>
    %27 = arith.truncf %21 : vector<24x8xf32> to vector<24x8xbf16>
    %cst_14 = arith.constant dense<0.000000e+00> : vector<96x8xf32>
    %28 = tpu.matmul %4, %27, %cst_14 {dimension_numbers = #tpu.dot_dimension_numbers<[1], [0], [0], [1], [0, 0, 1, 1], [], []>} : vector<96x24xbf16>, vector<24x8xbf16>, vector<96x8xf32> -> vector<96x8xf32>
    %29 = vector.extract_strided_slice %28 {offsets = [0, 0], sizes = [48, 4], strides = [1, 1]} : vector<96x8xf32> to vector<48x4xf32>
    %30 = vector.extract_strided_slice %28 {offsets = [48, 4], sizes = [48, 4], strides = [1, 1]} : vector<96x8xf32> to vector<48x4xf32>
    %31 = arith.addf %29, %30 : vector<48x4xf32>
    %32 = arith.addf %31, %26 : vector<48x4xf32>
    %cst_15 = arith.constant 0.000000e+00 : f32
    %33 = vector.broadcast %cst_15 : f32 to vector<48x4xf32>
    %34 = arith.cmpf ogt, %32, %33 : vector<48x4xf32>
    %cst_16 = arith.constant 2.000000e-01 : f32
    %35 = vector.broadcast %cst_16 : f32 to vector<48x4xf32>
    %36 = arith.mulf %35, %32 : vector<48x4xf32>
    %37 = arith.select %34, %32, %36 : vector<48x4xi1>, vector<48x4xf32>
    %38 = arith.truncf %37 : vector<48x4xf32> to vector<48x4xbf16>
    %cst_17 = arith.constant dense<0.000000e+00> : vector<24x4xf32>
    %39 = tpu.matmul %7, %38, %cst_17 {dimension_numbers = #tpu.dot_dimension_numbers<[1], [0], [0], [1], [0, 0, 1, 1], [], []>} : vector<24x48xbf16>, vector<48x4xbf16>, vector<24x4xf32> -> vector<24x4xf32>
    %c0_18 = arith.constant 0 : index
    %c0_19 = arith.constant 0 : index
    %40 = vector.load %arg6[%c0_18, %c0_19] : memref<24x1xf32, #tpu.memory_space<vmem>>, vector<24x1xf32>
    %41 = vector.broadcast %40 : vector<24x1xf32> to vector<24x4xf32>
    %42 = arith.mulf %39, %41 : vector<24x4xf32>
    %43 = arith.truncf %42 : vector<24x4xf32> to vector<24x4xbf16>
    %cst_20 = arith.constant dense<0.000000e+00> : vector<48x4xf32>
    %44 = tpu.matmul %6, %43, %cst_20 {dimension_numbers = #tpu.dot_dimension_numbers<[1], [0], [0], [1], [0, 0, 1, 1], [], []>} : vector<48x24xbf16>, vector<24x4xbf16>, vector<48x4xf32> -> vector<48x4xf32>
    %45 = arith.subf %37, %44 : vector<48x4xf32>
    %cst_21 = arith.constant 8.000000e+01 : f32
    %46 = vector.broadcast %cst_21 : f32 to vector<48x4xf32>
    %47 = arith.minimumf %45, %46 : vector<48x4xf32>
    %48 = math.exp %47 : vector<48x4xf32>
    %49 = arith.truncf %20 : vector<24x128xf32> to vector<24x128xbf16>
    %cst_22 = arith.constant dense<0.000000e+00> : vector<48x128xf32>
    %50 = tpu.matmul %5, %49, %cst_22 {dimension_numbers = #tpu.dot_dimension_numbers<[1], [0], [0], [1], [0, 0, 1, 1], [], []>} : vector<48x24xbf16>, vector<24x128xbf16>, vector<48x128xf32> -> vector<48x128xf32>
    %51 = arith.addf %50, %25 : vector<48x128xf32>
    %52 = vector.extract_strided_slice %51 {offsets = [0, 0], sizes = [48, 32], strides = [1, 1]} : vector<48x128xf32> to vector<48x32xf32>
    %53 = vector.extract_strided_slice %48 {offsets = [0, 0], sizes = [48, 1], strides = [1, 1]} : vector<48x4xf32> to vector<48x1xf32>
    %54 = vector.broadcast %53 : vector<48x1xf32> to vector<48x32xf32>
    %55 = arith.mulf %52, %54 : vector<48x32xf32>
    %56 = arith.truncf %55 : vector<48x32xf32> to vector<48x32xbf16>
    %57 = vector.extract_strided_slice %51 {offsets = [0, 32], sizes = [48, 32], strides = [1, 1]} : vector<48x128xf32> to vector<48x32xf32>
    %58 = vector.extract_strided_slice %48 {offsets = [0, 1], sizes = [48, 1], strides = [1, 1]} : vector<48x4xf32> to vector<48x1xf32>
    %59 = vector.broadcast %58 : vector<48x1xf32> to vector<48x32xf32>
    %60 = arith.mulf %57, %59 : vector<48x32xf32>
    %61 = arith.truncf %60 : vector<48x32xf32> to vector<48x32xbf16>
    %62 = vector.extract_strided_slice %51 {offsets = [0, 64], sizes = [48, 32], strides = [1, 1]} : vector<48x128xf32> to vector<48x32xf32>
    %63 = vector.extract_strided_slice %48 {offsets = [0, 2], sizes = [48, 1], strides = [1, 1]} : vector<48x4xf32> to vector<48x1xf32>
    %64 = vector.broadcast %63 : vector<48x1xf32> to vector<48x32xf32>
    %65 = arith.mulf %62, %64 : vector<48x32xf32>
    %66 = arith.truncf %65 : vector<48x32xf32> to vector<48x32xbf16>
    %67 = vector.extract_strided_slice %51 {offsets = [0, 96], sizes = [48, 32], strides = [1, 1]} : vector<48x128xf32> to vector<48x32xf32>
    %68 = vector.extract_strided_slice %48 {offsets = [0, 3], sizes = [48, 1], strides = [1, 1]} : vector<48x4xf32> to vector<48x1xf32>
    %69 = vector.broadcast %68 : vector<48x1xf32> to vector<48x32xf32>
    %70 = arith.mulf %67, %69 : vector<48x32xf32>
    %71 = arith.truncf %70 : vector<48x32xf32> to vector<48x32xbf16>
    %72 = arith.truncf %48 : vector<48x4xf32> to vector<48x4xbf16>
    %73 = tpu.concatenate %56, %61, %66, %71, %72 in 1 : vector<48x32xbf16>, vector<48x32xbf16>, vector<48x32xbf16>, vector<48x32xbf16>, vector<48x4xbf16> -> vector<48x132xbf16>
    %cst_23 = arith.constant dense<0.000000e+00> : vector<24x132xf32>
    %74 = tpu.matmul %7, %73, %cst_23 {dimension_numbers = #tpu.dot_dimension_numbers<[1], [0], [0], [1], [0, 0, 1, 1], [], []>} : vector<24x48xbf16>, vector<48x132xbf16>, vector<24x132xf32> -> vector<24x132xf32>
    %75 = vector.extract_strided_slice %74 {offsets = [0, 0], sizes = [24, 128], strides = [1, 1]} : vector<24x132xf32> to vector<24x128xf32>
    %76 = vector.extract_strided_slice %74 {offsets = [0, 128], sizes = [24, 4], strides = [1, 1]} : vector<24x132xf32> to vector<24x4xf32>
    %cst_24 = arith.constant 0.000000e+00 : f32
    %77 = vector.broadcast %cst_24 : f32 to vector<24x4xf32>
    %78 = arith.cmpf ogt, %76, %77 : vector<24x4xf32>
    %cst_25 = arith.constant 1.000000e+00 : f32
    %79 = vector.broadcast %cst_25 : f32 to vector<24x4xf32>
    %80 = arith.select %78, %76, %79 : vector<24x4xi1>, vector<24x4xf32>
    %cst_26 = arith.constant 0.000000e+00 : f32
    %81 = vector.broadcast %cst_26 : f32 to vector<24x4xf32>
    %82 = arith.cmpf ogt, %76, %81 : vector<24x4xf32>
    %cst_27 = arith.constant 1.000000e+00 : f32
    %83 = vector.broadcast %cst_27 : f32 to vector<24x4xf32>
    %84 = arith.divf %83, %80 : vector<24x4xf32>
    %cst_28 = arith.constant 0.000000e+00 : f32
    %85 = vector.broadcast %cst_28 : f32 to vector<24x4xf32>
    %86 = arith.select %82, %84, %85 : vector<24x4xi1>, vector<24x4xf32>
    %87 = vector.extract_strided_slice %75 {offsets = [0, 0], sizes = [24, 32], strides = [1, 1]} : vector<24x128xf32> to vector<24x32xf32>
    %88 = vector.extract_strided_slice %86 {offsets = [0, 0], sizes = [24, 1], strides = [1, 1]} : vector<24x4xf32> to vector<24x1xf32>
    %89 = vector.broadcast %88 : vector<24x1xf32> to vector<24x32xf32>
    %90 = arith.mulf %87, %89 : vector<24x32xf32>
    %91 = vector.extract_strided_slice %75 {offsets = [0, 32], sizes = [24, 32], strides = [1, 1]} : vector<24x128xf32> to vector<24x32xf32>
    %92 = vector.extract_strided_slice %86 {offsets = [0, 1], sizes = [24, 1], strides = [1, 1]} : vector<24x4xf32> to vector<24x1xf32>
    %93 = vector.broadcast %92 : vector<24x1xf32> to vector<24x32xf32>
    %94 = arith.mulf %91, %93 : vector<24x32xf32>
    %95 = arith.addf %90, %94 : vector<24x32xf32>
    %96 = vector.extract_strided_slice %75 {offsets = [0, 64], sizes = [24, 32], strides = [1, 1]} : vector<24x128xf32> to vector<24x32xf32>
    %97 = vector.extract_strided_slice %86 {offsets = [0, 2], sizes = [24, 1], strides = [1, 1]} : vector<24x4xf32> to vector<24x1xf32>
    %98 = vector.broadcast %97 : vector<24x1xf32> to vector<24x32xf32>
    %99 = arith.mulf %96, %98 : vector<24x32xf32>
    %100 = arith.addf %95, %99 : vector<24x32xf32>
    %101 = vector.extract_strided_slice %75 {offsets = [0, 96], sizes = [24, 32], strides = [1, 1]} : vector<24x128xf32> to vector<24x32xf32>
    %102 = vector.extract_strided_slice %86 {offsets = [0, 3], sizes = [24, 1], strides = [1, 1]} : vector<24x4xf32> to vector<24x1xf32>
    %103 = vector.broadcast %102 : vector<24x1xf32> to vector<24x32xf32>
    %104 = arith.mulf %101, %103 : vector<24x32xf32>
    %105 = arith.addf %100, %104 : vector<24x32xf32>
    %cst_29 = arith.constant 2.500000e-01 : f32
    %106 = vector.broadcast %cst_29 : f32 to vector<24x32xf32>
    %107 = arith.mulf %105, %106 : vector<24x32xf32>
    %108 = vector.broadcast %9 : vector<1x32xf32> to vector<24x32xf32>
    %109 = arith.addf %107, %108 : vector<24x32xf32>
    %cst_30 = arith.constant 0.000000e+00 : f32
    %110 = vector.broadcast %cst_30 : f32 to vector<24x32xf32>
    %111 = arith.maximumf %109, %110 : vector<24x32xf32>
    %112 = vector.broadcast %10 : vector<1x32xf32> to vector<24x32xf32>
    %113 = arith.mulf %111, %112 : vector<24x32xf32>
    %114 = vector.broadcast %11 : vector<1x32xf32> to vector<24x32xf32>
    %115 = arith.addf %113, %114 : vector<24x32xf32>
    %c0_31 = arith.constant 0 : index
    %c0_32 = arith.constant 0 : index
    %116 = vector.load %arg4[%c0_31, %c0_32] : memref<3x24xf32, #tpu.memory_space<vmem>>, vector<3x24xf32>
    %cst_33 = arith.constant dense<0.000000e+00> : vector<3x32xf32>
    %117 = tpu.matmul %116, %115, %cst_33 {dimension_numbers = #tpu.dot_dimension_numbers<[1], [0], [0], [1], [0, 0, 1, 1], [], []>} : vector<3x24xf32>, vector<24x32xf32>, vector<3x32xf32> -> vector<3x32xf32>
    %118 = vector.broadcast %16 : vector<3x1xf32> to vector<3x32xf32>
    %119 = arith.mulf %117, %118 : vector<3x32xf32>
    %c0_34 = arith.constant 0 : index
    %c0_35 = arith.constant 0 : index
    %120 = vector.load %arg5[%c0_34, %c0_35] : memref<24x1xi32, #tpu.memory_space<vmem>>, vector<24x1xi32>
    %c0_i32 = arith.constant 0 : i32
    %121 = vector.broadcast %c0_i32 : i32 to vector<24x1xi32>
    %122 = arith.cmpi eq, %120, %121 : vector<24x1xi32>
    %cst_36 = arith.constant -1.000000e+30 : f32
    %123 = vector.shape_cast %122 : vector<24x1xi1> to vector<24x1xi1>
    %124 = vector.broadcast %123 : vector<24x1xi1> to vector<24x32xi1>
    %125 = vector.broadcast %cst_36 : f32 to vector<24x32xf32>
    %126 = arith.select %124, %115, %125 : vector<24x32xi1>, vector<24x32xf32>
    %cst_37 = arith.constant dense<0xFF800000> : vector<32xf32>
    %127 = vector.multi_reduction <maximumf>, %126, %cst_37 [0] : vector<24x32xf32> to vector<32xf32>
    %128 = vector.shape_cast %127 : vector<32xf32> to vector<1x32xf32>
    %c1_i32 = arith.constant 1 : i32
    %129 = vector.broadcast %c1_i32 : i32 to vector<24x1xi32>
    %130 = arith.cmpi eq, %120, %129 : vector<24x1xi32>
    %cst_38 = arith.constant -1.000000e+30 : f32
    %131 = vector.shape_cast %130 : vector<24x1xi1> to vector<24x1xi1>
    %132 = vector.broadcast %131 : vector<24x1xi1> to vector<24x32xi1>
    %133 = vector.broadcast %cst_38 : f32 to vector<24x32xf32>
    %134 = arith.select %132, %115, %133 : vector<24x32xi1>, vector<24x32xf32>
    %cst_39 = arith.constant dense<0xFF800000> : vector<32xf32>
    %135 = vector.multi_reduction <maximumf>, %134, %cst_39 [0] : vector<24x32xf32> to vector<32xf32>
    %136 = vector.shape_cast %135 : vector<32xf32> to vector<1x32xf32>
    %c2_i32 = arith.constant 2 : i32
    %137 = vector.broadcast %c2_i32 : i32 to vector<24x1xi32>
    %138 = arith.cmpi eq, %120, %137 : vector<24x1xi32>
    %cst_40 = arith.constant -1.000000e+30 : f32
    %139 = vector.shape_cast %138 : vector<24x1xi1> to vector<24x1xi1>
    %140 = vector.broadcast %139 : vector<24x1xi1> to vector<24x32xi1>
    %141 = vector.broadcast %cst_40 : f32 to vector<24x32xf32>
    %142 = arith.select %140, %115, %141 : vector<24x32xi1>, vector<24x32xf32>
    %cst_41 = arith.constant dense<0xFF800000> : vector<32xf32>
    %143 = vector.multi_reduction <maximumf>, %142, %cst_41 [0] : vector<24x32xf32> to vector<32xf32>
    %144 = vector.shape_cast %143 : vector<32xf32> to vector<1x32xf32>
    %145 = tpu.concatenate %128, %136, %144 in 0 : vector<1x32xf32>, vector<1x32xf32>, vector<1x32xf32> -> vector<3x32xf32>
    %cst_42 = arith.constant 0.000000e+00 : f32
    %146 = vector.broadcast %cst_42 : f32 to vector<3x1xf32>
    %147 = arith.cmpf ogt, %16, %146 : vector<3x1xf32>
    %cst_43 = arith.constant 0.000000e+00 : f32
    %148 = vector.shape_cast %147 : vector<3x1xi1> to vector<3x1xi1>
    %149 = vector.broadcast %148 : vector<3x1xi1> to vector<3x32xi1>
    %150 = vector.broadcast %cst_43 : f32 to vector<3x32xf32>
    %151 = arith.select %149, %145, %150 : vector<3x32xi1>, vector<3x32xf32>
    %152 = tpu.concatenate %151, %119 in 1 : vector<3x32xf32>, vector<3x32xf32> -> vector<3x64xf32>
    %c0_44 = arith.constant 0 : index
    %c0_45 = arith.constant 0 : index
    %c0_46 = arith.constant 0 : index
    %153 = vector.load %arg10[%c0_44, %c0_45, %c0_46] : memref<2x64x64xf32, #tpu.memory_space<vmem>>, vector<1x64x64xf32>
    %154 = vector.shape_cast %153 : vector<1x64x64xf32> to vector<64x64xf32>
    %cst_47 = arith.constant dense<0.000000e+00> : vector<3x64xf32>
    %155 = tpu.matmul %152, %154, %cst_47 {dimension_numbers = #tpu.dot_dimension_numbers<[1], [0], [0], [1], [0, 0, 1, 1], [], []>} : vector<3x64xf32>, vector<64x64xf32>, vector<3x64xf32> -> vector<3x64xf32>
    %156 = vector.broadcast %12 : vector<1x64xf32> to vector<3x64xf32>
    %157 = arith.addf %155, %156 : vector<3x64xf32>
    %cst_48 = arith.constant 0.000000e+00 : f32
    %158 = vector.broadcast %cst_48 : f32 to vector<3x64xf32>
    %159 = arith.maximumf %157, %158 : vector<3x64xf32>
    %c1 = arith.constant 1 : index
    %c0_49 = arith.constant 0 : index
    %c0_50 = arith.constant 0 : index
    %160 = vector.load %arg10[%c1, %c0_49, %c0_50] : memref<2x64x64xf32, #tpu.memory_space<vmem>>, vector<1x64x64xf32>
    %161 = vector.shape_cast %160 : vector<1x64x64xf32> to vector<64x64xf32>
    %cst_51 = arith.constant dense<0.000000e+00> : vector<3x64xf32>
    %162 = tpu.matmul %159, %161, %cst_51 {dimension_numbers = #tpu.dot_dimension_numbers<[1], [0], [0], [1], [0, 0, 1, 1], [], []>} : vector<3x64xf32>, vector<64x64xf32>, vector<3x64xf32> -> vector<3x64xf32>
    %163 = vector.broadcast %13 : vector<1x64xf32> to vector<3x64xf32>
    %164 = arith.addf %162, %163 : vector<3x64xf32>
    %cst_52 = arith.constant 0.000000e+00 : f32
    %165 = vector.broadcast %cst_52 : f32 to vector<3x64xf32>
    %166 = arith.maximumf %164, %165 : vector<3x64xf32>
    %167 = vector.broadcast %14 : vector<1x64xf32> to vector<3x64xf32>
    %168 = arith.mulf %166, %167 : vector<3x64xf32>
    %cst_53 = arith.constant dense<0.000000e+00> : vector<3xf32>
    %169 = vector.multi_reduction <add>, %168, %cst_53 [1] : vector<3x64xf32> to vector<3xf32>
    %170 = vector.shape_cast %169 : vector<3xf32> to vector<3x1xf32>
    %171 = vector.broadcast %15 : vector<1x1xf32> to vector<3x1xf32>
    %172 = arith.addf %170, %171 : vector<3x1xf32>
    %c0_54 = arith.constant 0 : index
    %c0_55 = arith.constant 0 : index
    %173 = vector.load %arg11[%c0_54, %c0_55] : memref<3x1xf32, #tpu.memory_space<vmem>>, vector<3x1xf32>
    tpu.vector_store %arg11[%c0_54, %c0_55], %172 {strides = array<i32>} : memref<3x1xf32, #tpu.memory_space<vmem>>, vector<3x1xf32>,
    return
  }
}

</mosaic_0001>

<bundles_post_ra>
// kernel: tpu_custom_call.1
= control target key start
LH: loop header
LB: loop body
LE: loop exit
PB: predicated region body
PF: predicated region fallthrough
CT: control target
= control target key end

     0   :  { %16 = vsyncpa [#allocation3], 0  ;;  %s1356_s20 = smov [#allocation2]   ;;  %s1357_s22 = smov 64   ;;  %s1825_s0 = inlined_call_operand.vmem [shape: f32[24,16], index: 0, kind: input, shape index: {}]   ;;  %s1826_s1 = inlined_call_operand.vmem [shape: f32[48,8], index: 1, kind: input, shape index: {}]   ;;  %s1827_s2 = inlined_call_operand.vmem [shape: bf16[96,24], index: 2, kind: input, shape index: {}]   ;;  %s1828_s3 = inlined_call_operand.hbm [shape: bf16[24,48], index: 3, kind: input, shape index: {}]   ;;  %s1829_s4 = inlined_call_operand.vmem [shape: f32[3,24], index: 4, kind: input, shape index: {}]   ;;  %s1830_s5 = inlined_call_operand.vmem [shape: s32[24,1], index: 5, kind: input, shape index: {}]   ;;  %s1831_s6 = inlined_call_operand.vmem [shape: f32[24,1], index: 6, kind: input, shape index: {}]   ;;  %s1832_s7 = inlined_call_operand.vmem [shape: f32[16,136], index: 7, kind: input, shape index: {}]   ;;  %s1833_s8 = inlined_call_operand.vmem [shape: f32[8,132], index: 8, kind: input, shape index: {}]   ;;  %s1834_s9 = inlined_call_operand.vmem [shape: f32[11,64], index: 9, kind: input, shape index: {}]   ;;  %s1835_s10 = inlined_call_operand.vmem [shape: f32[2,64,64], index: 10, kind: input, shape index: {}]   ;;  %s1836_s11 = inlined_call_operand.vmem [shape: f32[3,1], index: 11, kind: output, shape index: {}]  }
   0x1   :  { %s27_s19 = sshll.u32 %s1828_s3, 4  ;;  %s29_s21 = sshll.u32 %s1356_s20, 4  ;;  %s28_s19 = int_to_ptr.hbm [resolvable:$true] %s27_s19  ;;  %s30_s21 = int_to_ptr.vmem [resolvable:$true] %s29_s21 }
   0x2   :  { %s1358_s23 = smov 4  }
   0x3   :  { %35 = dma.hbm_to_vmem [thread:$0]  %s28_s19, 192, %s30_s21, [#allocation3], %s1357_s22, %s1357_s22, %s1358_s23  }
   0x4   :  { %1354 = dma.done.wait [#allocation3], 192  }
   0x5   :  { %1355 = vsyncadd [#allocation3], 4294967104  ;;  %v87_v0 = vld [vmem:[%s1832_s7 + $0x8] sm:$0xff]  ;;  %v89_v1 = vld [vmem:[%s1832_s7 + $0x18] sm:$0xff]  ;;  %vm92_vm0 = vcmask 130048   ;;  %vm149_vm1 = vcmask 1043456  }
   0x6   :  { %v55_v2 = vld [vmem:[%s1825_s0] sm:$0xff]  ;;  %v91_v3 = vpack.c.bf16 %v89_v1, %v87_v0  ;;  %v56_v4 = vld [vmem:[%s1825_s0 + $0x8] sm:$0xff]  ;;  %v88_v7 = vld [vmem:[%s1832_s7 + $0x10] sm:$0xff]  ;;  %vm236_vm2 = vcmask 195584   ;;  %vm139_vm3 = vcmask 64512   ;;  %s1359_s20 = smov 124  }
   0x7   :  { %v86_v5 = vld [vmem:[%s1832_s7] sm:$0xff]  ;;  %v58_v6 = vpack.c.bf16 %v56_v4, %v55_v2  ;;  %v57_v8 = vld [vmem:[%s1825_s0 + $0x10] sm:$0xff]  ;;  %v1262_v19 = vld [vmem:[%s1827_s2 + $0x8] sm:$0xff]  ;;  %v1360_v62 = vmov 0   ;;  %vm362_vm10 = vcmask 392192   ;;  %vm724_vm11 = vcmask 261120  }
   0x8   :  { %124 = vmatpush.bf16.msra.mxu1 %v91_v3  ;;  %v90_v9 = vpack.c.bf16 %v88_v7, %v86_v5  ;;  %v59_v10 = vpack.c.bf16 %v57_v8, %v57_v8  ;;  %v1261_v17 = vld [vmem:[%s1827_s2] sm:$0xff]  ;;  %v1263_v20 = vld [vmem:[%s1827_s2 + $0x10] sm:$0xff]  ;;  %v1468_v21 = vld [vmem:[%s1827_s2 + $0x18] sm:$0xff]  ;;  %1280 = vset.pattern.permute.xlu1 %v1360_v62  ;;  %vm734_vm12 = vcmask 523264   ;;  %vm741_vm13 = vcmask 785408  }
   0x9   :  { %v136_v24 = vld [vmem:[%s1833_s8 + $0x8] sm:$0xff]  ;;  %v1480_v32 = vld [vmem:[%s1827_s2 + $0x20] sm:$0xff]  ;;  %v62_v38 = vld [vmem:[%s1826_s1 + $0x10] sm:$0xff]  ;;  %1279 = vset.pattern.permute.xlu0 %v1360_v62  ;;  %1281 = vset.pattern.permute.xlu2 %v1360_v62 }
   0xa   :  { %1268 = vmatpush.bf16.msra.mxu3 %v90_v9  ;;  %106 = vmatpush.bf16.msra.mxu0 %v90_v9  ;;  %v138_v26 = vpack.c.bf16 %v136_v24, %v136_v24  ;;  %v1487_v33 = vld [vmem:[%s1827_s2 + $0x28] sm:$0xff]  ;;  %v60_v34 = vld [vmem:[%s1826_s1] sm:$0xff]  ;;  %v63_v39 = vld [vmem:[%s1826_s1 + $0x18] sm:$0xff] }
   0xb   :  { %1196 = vmatmul.msk.bf16.vlgmr.msra.gmra.mxu1 %vm92_vm0, %v58_v6  ;;  %v61_v35 = vld [vmem:[%s1826_s1 + $0x8] sm:$0xff]  ;;  %v1507_v41 = vpack.c.bf16 %v63_v39, %v62_v38  ;;  %v64_v43 = vld [vmem:[%s1826_s1 + $0x20] sm:$0xff] }
   0xc   :  { %v154_v28 = vsel %vm149_vm1, %v138_v26, 0  ;;  %v1497_v36 = vpack.c.bf16 %v61_v35, %v60_v34  ;;  %v65_v44 = vld [vmem:[%s1826_s1 + $0x28] sm:$0xff]  ;;  %v387_v61 = vld [vmem:[%s1831_s6] sm:$0xff] }
   0xd   :  { %1195 = vmatmul.msk.bf16.vlgmr.msra.gmra.mxu3 %vm92_vm0, %v59_v10  ;;  %1194 = vmatmul.msk.bf16.vlgmr.msra.gmra.mxu0 %vm92_vm0, %v58_v6  ;;  %v1517_v46 = vpack.c.bf16 %v65_v44, %v64_v43  ;;  %v83_v43 = vld [vmem:[#allocation2 + $0x8] sm:$0xf] }
   0xe   :  { %187 = vmatpush.bf16.msrb.mxu3 %v154_v28  ;;  %v359_v44 = vunpack.c.l.b16 %v83_v43 }
  0x1b   :  { %1197 = vmatmul.msk.bf16.gmra.mxu1 %vm92_vm0, %v59_v10 }
  0x1d   :  { %1201 = vmatmul.msk.bf16.vlgmr.msrb.gmra.mxu3 %vm139_vm3, %v1497_v36 }
  0x2d   :  { %1202 = vmatmul.msk.bf16.gmra.mxu3 %vm139_vm3, %v1507_v41 }
  0x3d   :  { %1203 = vmatmul.msk.bf16.gmra.mxu3 %vm139_vm3, %v1517_v46 }
  0x88   :  { %v126_v11 = vpop.f32.mrf.mxu1 }
  0x8a   :  { %v108_v22 = vpop.f32.mrf.mxu0 }
  0x90   :  { %v128_v12 = vpop.f32.mrf.mxu1  ;;  %v113_v23 = vpop.f32.mrf.mxu3 }
  0x91   :  { %v204_v16 = vpack.c.bf16 %v128_v12, %v126_v11  ;;  %v462_v25 = vpack.c.bf16 %v113_v23, %v113_v23 }
  0x92   :  { %v110_v29 = vpop.f32.mrf.mxu0 }
  0x93   :  { %v464_v27 = vsel %vm149_vm1, %v462_v25, 0  ;;  %v461_v31 = vpack.c.bf16 %v110_v29, %v108_v22  ;;  %v135_v22 = vld [vmem:[%s1833_s8] sm:$0xff]  ;;  %s1365_s8 = smov 32  }
  0x94   :  { %472 = vmatpush.bf16.msra.mxu3 %v464_v27  ;;  %v137_v23 = vpack.c.bf16 %v135_v22, %v135_v22 }
  0x96   :  { %v151_v29 = vsel %vm149_vm1, %v137_v23, 0 }
  0x97   :  { %163 = vmatpush.bf16.msra.mxu2 %v151_v29 }
  0x98   :  { %v131_v13 = vpop.f32.mrf.mxu1  ;;  %v115_v30 = vpop.f32.mrf.mxu3  ;;  %473 = vmatpush.bf16.msra.mxu3 %v461_v31 }
  0x99   :  { %v205_v14 = vpack.c.bf16 %v131_v13, %v131_v13 }
  0x9a   :  { %1198 = vmatmul.msk.bf16.vlgmr.msra.gmra.mxu2 %vm139_vm3, %v1497_v36 }
  0x9b   :  { %v256_v15 = vsel %vm149_vm1, %v205_v14, 0  ;;  %1243 = vmatmul.msk.bf16.vlgmr.msra.gmra.mxu3 %vm236_vm2, %v1261_v17 }
  0x9c   :  { %264 = vmatpush.bf16.msrb.mxu0 %v256_v15 }
  0xa0   :  { %v133_v18 = vpop.f32.mrf.mxu1  ;;  %265 = vmatpush.bf16.msrb.mxu0 %v204_v16  ;;  %v189_v55 = vpop.f32.mrf.mxu3 }
  0xa3   :  { %1228 = vmatmul.msk.bf16.vlgmr.msrb.gmra.mxu0 %vm236_vm2, %v1261_v17 }
  0xa8   :  { %v191_v56 = vpop.f32.mrf.mxu3 }
  0xaa   :  { %1199 = vmatmul.msk.bf16.gmra.mxu2 %vm139_vm3, %v1507_v41 }
  0xab   :  { %1244 = vmatmul.msk.bf16.gmra.mxu3 %vm236_vm2, %v1262_v19 }
  0xb0   :  { %v194_v57 = vpop.f32.mrf.mxu3 }
  0xb3   :  { %1229 = vmatmul.msk.bf16.gmra.mxu0 %vm236_vm2, %v1262_v19  ;;  %v389_v19 = vld [vmem:[%s1831_s6 + $0x10] sm:$0xff] }
  0xb8   :  { %v196_v58 = vpop.f32.mrf.mxu3 }
  0xba   :  { %1200 = vmatmul.msk.bf16.gmra.mxu2 %vm139_vm3, %v1517_v46 }
  0xbb   :  { %1245 = vmatmul.msk.bf16.gmra.mxu3 %vm236_vm2, %v1263_v20 }
  0xc0   :  { %v199_v63 = vpop.f32.mrf.mxu3 }
  0xc3   :  { %1230 = vmatmul.msk.bf16.gmra.mxu0 %vm236_vm2, %v1263_v20  ;;  %v388_v20 = vld [vmem:[%s1831_s6 + $0x8] sm:$0xff]  ;;  %s1364_s6 = smov 96  }
  0xc8   :  { %v201_v11 = vpop.f32.mrf.mxu3 }
  0xd3   :  { %1231 = vmatmul.msk.bf16.gmra.mxu0 %vm236_vm2, %v1468_v21 }
  0xe3   :  { %1232 = vmatmul.msk.bf16.gmra.mxu0 %vm236_vm2, %v1480_v32 }
  0xf3   :  { %1233 = vmatmul.msk.bf16.gmra.mxu0 %vm236_vm2, %v1487_v33 }
 0x11d   :  { %v1570_v46 = vpop.f32.mrf.mxu2 }
 0x120   :  { %v267_v37 = vpop.f32.mrf.mxu0 }
 0x128   :  { %v269_v40 = vpop.f32.mrf.mxu0 }
 0x130   :  { %v272_v42 = vpop.f32.mrf.mxu0 }
 0x138   :  { %v274_v45 = vpop.f32.mrf.mxu0 }
 0x140   :  { %v277_v47 = vpop.f32.mrf.mxu0 }
 0x148   :  { %v279_v48 = vpop.f32.mrf.mxu0 }
 0x150   :  { %v282_v49 = vpop.f32.mrf.mxu0 }
 0x151   :  { %303 = vrot.lane.b32.xlu2 %v282_v49, %s1359_s20 }
 0x158   :  { %v284_v50 = vpop.f32.mrf.mxu0 }
 0x159   :  { %305 = vrot.lane.b32.xlu2 %v284_v50, %s1359_s20 }
 0x160   :  { %v287_v51 = vpop.f32.mrf.mxu0 }
 0x161   :  { %307 = vrot.lane.b32.xlu1 %v287_v51, %s1359_s20  ;;  %397 = vperm.xlu2 %1281, %v388_v20  }
 0x168   :  { %v289_v52 = vpop.f32.mrf.mxu0 }
 0x169   :  { %309 = vrot.lane.b32.xlu1 %v289_v52, %s1359_s20 }
 0x170   :  { %v292_v53 = vpop.f32.mrf.mxu0 }
 0x171   :  { %311 = vrot.lane.b32.xlu0 %v292_v53, %s1359_s20  ;;  %392 = vperm.xlu1 %1280, %v387_v61   ;;  %v1361_v61 = vmov 1  }
 0x178   :  { %v294_v54 = vpop.f32.mrf.mxu0 }
 0x179   :  { %313 = vrot.lane.b32.xlu0 %v294_v54, %s1359_s20  ;;  %1282 = vset.pattern.permute.xlu1 %v1361_v61 }
 0x181   :  { %402 = vperm.xlu0 %1279, %v389_v19  }
 0x1ab   :  { %v304_v60 = vpop.permute.xlu2 %303 }
 0x1ac   :  { %v321_v12 = vadd.f32 %v304_v60, %v267_v37 }
 0x1ae   :  { %v327_v24 = vadd.f32 %v321_v12, %v189_v55  ;;  %v1362_v12 = vmov 3  }
 0x1b0   :  { %v339_v34 = vmul.f32 0.2, %v327_v24  ;;  %vm333_vm9 = vcmp.gt.f32.partialorder %v327_v24, 0.0 }
 0x1b2   :  { %v345_v39 = vsel %vm333_vm9, %v327_v24, %v339_v34 }
 0x1b3   :  { %v306_v4 = vpop.permute.xlu2 %305 }
 0x1b4   :  { %v322_v9 = vadd.f32 %v306_v4, %v269_v40 }
 0x1b6   :  { %v328_v17 = vadd.f32 %v322_v9, %v191_v56 }
 0x1b8   :  { %v340_v30 = vmul.f32 0.2, %v328_v17  ;;  %vm334_vm8 = vcmp.gt.f32.partialorder %v328_v17, 0.0 }
 0x1ba   :  { %v346_v38 = vsel %vm334_vm8, %v328_v17, %v340_v30 }
 0x1bb   :  { %v351_v40 = vpack.c.bf16 %v346_v38, %v345_v39  ;;  %v398_v50 = vpop.permute.xlu2 %397 }
 0x1d3   :  { %v308_v59 = vpop.permute.xlu1 %307 }
 0x1d4   :  { %v323_v5 = vadd.f32 %v308_v59, %v272_v42  ;;  %v1551_v42 = vld [vmem:[#allocation2] sm:$0xff] }
 0x1d6   :  { %v329_v13 = vadd.f32 %v323_v5, %v194_v57 }
 0x1d8   :  { %v341_v27 = vmul.f32 0.2, %v329_v13  ;;  %vm335_vm7 = vcmp.gt.f32.partialorder %v329_v13, 0.0 }
 0x1da   :  { %v347_v35 = vsel %vm335_vm7, %v329_v13, %v341_v27 }
 0x1db   :  { %v310_v1 = vpop.permute.xlu1 %309 }
 0x1dc   :  { %v324_v3 = vadd.f32 %v310_v1, %v274_v45  ;;  %v1557_v45 = vpack.c.b16 %v359_v44, %v359_v44 }
 0x1de   :  { %v330_v7 = vadd.f32 %v324_v3, %v196_v58  ;;  %v1572_v58 = vpop.f32.mrf.mxu2 }
 0x1e0   :  { %v342_v16 = vmul.f32 0.2, %v330_v7  ;;  %vm336_vm6 = vcmp.gt.f32.partialorder %v330_v7, 0.0 }
 0x1e2   :  { %v1546_v31 = vsel %vm336_vm6, %v330_v7, %v342_v16 }
 0x1e3   :  { %v312_v0 = vpop.permute.xlu0 %311  ;;  %v352_v37 = vpack.c.bf16 %v1546_v31, %v347_v35  ;;  %v393_v52 = vpop.permute.xlu1 %392 }
 0x1e4   :  { %v325_v2 = vadd.f32 %v312_v0, %v277_v47 }
 0x1e6   :  { %v331_v6 = vadd.f32 %v325_v2, %v199_v63  ;;  %v1574_v59 = vpop.f32.mrf.mxu2 }
 0x1e8   :  { %v343_v15 = vmul.f32 0.2, %v331_v6  ;;  %vm337_vm4 = vcmp.gt.f32.partialorder %v331_v6, 0.0 }
 0x1ea   :  { %v1539_v25 = vsel %vm337_vm4, %v331_v6, %v343_v15 }
 0x1eb   :  { %v314_v8 = vpop.permute.xlu0 %313 }
 0x1ec   :  { %v326_v10 = vadd.f32 %v314_v8, %v279_v48 }
 0x1ee   :  { %v332_v14 = vadd.f32 %v326_v10, %v201_v11  ;;  %v1576_v60 = vpop.f32.mrf.mxu2 }
 0x1f0   :  { %vm338_vm5 = vcmp.gt.f32.partialorder %v332_v14, 0.0  ;;  %v344_v18 = vmul.f32 0.2, %v332_v14 }
 0x1f2   :  { %v1541_v26 = vsel %vm338_vm5, %v332_v14, %v344_v18  ;;  %v1363_v18 = vmov 2  }
 0x1f3   :  { %v353_v28 = vpack.c.bf16 %v1541_v26, %v1539_v25  ;;  %v403_v48 = vpop.permute.xlu0 %402 }
 0x1f5   :  { %374 = vmatpush.bf16.msrb.mxu1 %v353_v28 }
 0x1f6   :  { %v1579_v63 = vpop.f32.mrf.mxu2 }
 0x1f9   :  { %375 = vmatpush.bf16.msrb.mxu1 %v352_v37 }
 0x1fd   :  { %376 = vmatpush.bf16.msrb.mxu1 %v351_v40 }
 0x200   :  { %1238 = vmatmul.msk.bf16.vlgmr.msrb.gmra.mxu1 %vm362_vm10, %v1551_v42 }
 0x210   :  { %1239 = vmatmul.msk.bf16.gmra.mxu1 %vm362_vm10, %v1557_v45 }
 0x27d   :  { %v378_v36 = vpop.f32.mrf.mxu1 }
 0x27e   :  { %v405_v55 = vmul.f32 %v393_v52, %v378_v36 }
 0x285   :  { %v380_v47 = vpop.f32.mrf.mxu1 }
 0x286   :  { %v406_v54 = vmul.f32 %v398_v50, %v380_v47  ;;  %v475_v47 = vpop.f32.mrf.mxu3 }
 0x288   :  { %v408_v57 = vpack.c.bf16 %v406_v54, %v405_v55 }
 0x28d   :  { %v383_v49 = vpop.f32.mrf.mxu1 }
 0x28e   :  { %v407_v51 = vmul.f32 %v403_v48, %v383_v49  ;;  %v1632_v48 = vadd.f32 %v475_v47, %v1570_v46 }
 0x290   :  { %v409_v53 = vpack.c.bf16 %v407_v51, %v407_v51  ;;  %v477_v51 = vpop.f32.mrf.mxu3 }
 0x292   :  { %v411_v41 = vsel %vm149_vm1, %v409_v53, 0 }
 0x293   :  { %419 = vmatpush.bf16.msrb.mxu2 %v411_v41 }
 0x295   :  { %v385_v56 = vpop.f32.mrf.mxu1 }
 0x296   :  { %v1638_v56 = vadd.f32 %v477_v51, %v1572_v58 }
 0x297   :  { %420 = vmatpush.bf16.msrb.mxu2 %v408_v57 }
 0x298   :  { %v480_v53 = vpop.f32.mrf.mxu3 }
 0x29a   :  { %1240 = vmatmul.msk.bf16.vlgmr.msrb.gmra.mxu2 %vm236_vm2, %v1468_v21  ;;  %v1581_v21 = vpop.f32.mrf.mxu2 }
 0x2aa   :  { %1241 = vmatmul.msk.bf16.gmra.mxu2 %vm236_vm2, %v1480_v32 }
 0x2ba   :  { %1242 = vmatmul.msk.bf16.gmra.mxu2 %vm236_vm2, %v1487_v33 }
 0x31d   :  { %v422_v0 = vpop.f32.mrf.mxu2 }
 0x31e   :  { %v437_v32 = vsub.f32 %v345_v39, %v422_v0  ;;  %v482_v0 = vpop.f32.mrf.mxu3 }
 0x320   :  { %v443_v1 = vmin.f32 %v437_v32, 80.0 }
 0x322   :  { %v449_v2 = vmul.f32 1.442695, %v443_v1 }
 0x324   :  { %1312 = vpow2.f32 %v449_v2 }
 0x325   :  { %v424_v33 = vpop.f32.mrf.mxu2 }
 0x326   :  { %v438_v3 = vsub.f32 %v346_v38, %v424_v33  ;;  %v483_v33 = vadd.f32 %v482_v0, %v1576_v60 }
 0x328   :  { %v444_v4 = vmin.f32 %v438_v3, 80.0 }
 0x32a   :  { %v1583_v5 = vpop.eup %1312  ;;  %v451_v6 = vmul.f32 1.442695, %v444_v4 }
 0x32b   :  { %533 = vperm.xlu1 %1282, %v1583_v5   ;;  %492 = vperm.xlu2 %1281, %v1583_v5  }
 0x32c   :  { %1314 = vpow2.f32 %v451_v6 }
 0x32d   :  { %v427_v7 = vpop.f32.mrf.mxu2 }
 0x32e   :  { %v439_v8 = vsub.f32 %v347_v35, %v427_v7  ;;  %v481_v7 = vadd.f32 %v480_v53, %v1574_v59 }
 0x330   :  { %v445_v9 = vmin.f32 %v439_v8, 80.0 }
 0x332   :  { %v1587_v10 = vpop.eup %1314  ;;  %v453_v11 = vmul.f32 1.442695, %v445_v9 }
 0x333   :  { %497 = vperm.xlu0 %1279, %v1587_v10   ;;  %1283 = vset.pattern.permute.xlu1 %v1360_v62 }
 0x334   :  { %1316 = vpow2.f32 %v453_v11  ;;  %1286 = vset.pattern.permute.xlu2 %v1362_v12 }
 0x335   :  { %v429_v13 = vpop.f32.mrf.mxu2 }
 0x336   :  { %v440_v14 = vsub.f32 %v1546_v31, %v429_v13 }
 0x338   :  { %v446_v15 = vmin.f32 %v440_v14, 80.0 }
 0x33a   :  { %v1317_v16 = vpop.eup %1316  ;;  %v455_v17 = vmul.f32 1.442695, %v446_v15 }
 0x33b   :  { %1285 = vset.pattern.permute.xlu0 %v1363_v18  ;;  %613 = vperm.xlu2 %1286, %v1317_v16   ;;  %v642_v23 = vpack.c.bf16 %v1317_v16, %v1317_v16 }
 0x33c   :  { %1318 = vpow2.f32 %v455_v17  ;;  %502 = vperm.xlu1 %1283, %v1317_v16   ;;  %577 = vperm.xlu0 %1285, %v1317_v16  }
 0x33d   :  { %v432_v19 = vpop.f32.mrf.mxu2  ;;  %v1598_v30 = vunpack.c.l.b16 %v642_v23 }
 0x33e   :  { %v441_v20 = vsub.f32 %v1539_v25, %v432_v19 }
 0x340   :  { %v447_v22 = vmin.f32 %v441_v20, 80.0 }
 0x342   :  { %v1319_v24 = vpop.eup %1318  ;;  %v457_v27 = vmul.f32 1.442695, %v447_v22 }
 0x343   :  { %1287 = vset.pattern.permute.xlu2 %v1360_v62  ;;  %v643_v28 = vpack.c.bf16 %v1319_v24, %v1319_v24 }
 0x344   :  { %1320 = vpow2.f32 %v457_v27  ;;  %1284 = vset.pattern.permute.xlu1 %v1361_v61  ;;  %507 = vperm.xlu2 %1287, %v1319_v24  }
 0x345   :  { %541 = vperm.xlu1 %1284, %v1317_v16   ;;  %v434_v29 = vpop.f32.mrf.mxu2  ;;  %1292 = vset.pattern.permute.xlu0 %v1361_v61  ;;  %v1600_v31 = vunpack.c.l.b16 %v643_v28 }
 0x346   :  { %v442_v25 = vsub.f32 %v1541_v26, %v434_v29 }
 0x347   :  { %v719_v34 = vpack.c.b16 %v1600_v31, %v1598_v30 }
 0x348   :  { %v448_v35 = vmin.f32 %v442_v25, 80.0 }
 0x34a   :  { %v1321_v37 = vpop.eup %1320  ;;  %v459_v38 = vmul.f32 1.442695, %v448_v35 }
 0x34b   :  { %549 = vperm.xlu0 %1292, %v1321_v37   ;;  %v644_v39 = vpack.c.bf16 %v1321_v37, %v1321_v37 }
 0x34c   :  { %1322 = vpow2.f32 %v459_v38  ;;  %1288 = vset.pattern.permute.xlu2 %v1361_v61 }
 0x34d   :  { %1289 = vset.pattern.permute.xlu1 %v1363_v18  ;;  %545 = vperm.xlu2 %1288, %v1319_v24   ;;  %v1609_v26 = vunpack.c.l.b16 %v644_v39 }
 0x34e   :  { %581 = vperm.xlu1 %1289, %v1319_v24  }
 0x352   :  { %v1323_v40 = vpop.eup %1322 }
 0x353   :  { %1300 = vset.pattern.permute.xlu0 %v1362_v12  ;;  %v645_v43 = vpack.c.bf16 %v1323_v40, %v1323_v40 }
 0x354   :  { %625 = vperm.xlu0 %1300, %v1323_v40  }
 0x355   :  { %1293 = vset.pattern.permute.xlu2 %v1363_v18  ;;  %v1611_v44 = vunpack.c.l.b16 %v645_v43 }
 0x356   :  { %1290 = vset.pattern.permute.xlu1 %v1362_v12  ;;  %585 = vperm.xlu2 %1293, %v1321_v37  }
 0x357   :  { %617 = vperm.xlu1 %1290, %v1319_v24   ;;  %v720_v36 = vpack.c.b16 %v1611_v44, %v1609_v26 }
 0x35c   :  { %605 = vperm.xlu0 %1300, %v1583_v5  }
 0x35e   :  { %1294 = vset.pattern.permute.xlu2 %v1362_v12 }
 0x35f   :  { %1291 = vset.pattern.permute.xlu1 %v1360_v62  ;;  %621 = vperm.xlu2 %1294, %v1321_v37  }
 0x360   :  { %512 = vperm.xlu1 %1291, %v1321_v37  }
 0x364   :  { %1302 = vset.pattern.permute.xlu0 %v1361_v61 }
 0x367   :  { %1295 = vset.pattern.permute.xlu2 %v1360_v62 }
 0x368   :  { %1297 = vset.pattern.permute.xlu1 %v1361_v61  ;;  %517 = vperm.xlu2 %1295, %v1323_v40  }
 0x369   :  { %553 = vperm.xlu1 %1297, %v1323_v40  }
 0x370   :  { %1296 = vset.pattern.permute.xlu2 %v1361_v61 }
 0x371   :  { %1298 = vset.pattern.permute.xlu1 %v1363_v18  ;;  %537 = vperm.xlu2 %1296, %v1587_v10  }
 0x372   :  { %589 = vperm.xlu1 %1298, %v1323_v40  }
 0x379   :  { %1299 = vset.pattern.permute.xlu2 %v1363_v18 }
 0x37a   :  { %569 = vperm.xlu1 %1298, %v1583_v5   ;;  %573 = vperm.xlu2 %1299, %v1587_v10  }
 0x382   :  { %1301 = vset.pattern.permute.xlu1 %v1362_v12  ;;  %1305 = vset.pattern.permute.xlu2 %v1361_v61 }
 0x383   :  { %609 = vperm.xlu1 %1301, %v1587_v10  }
 0x385   :  { %v493_v49 = vpop.permute.xlu2 %492 }
 0x386   :  { %v520_v50 = vmul.f32 %v493_v49, %v1632_v48 }
 0x388   :  { %v526_v32 = vpack.c.bf16 %v520_v50, %v520_v50 }
 0x38b   :  { %1303 = vset.pattern.permute.xlu1 %v1361_v61  ;;  %v652_v61 = vunpack.c.l.b16 %v526_v32 }
 0x395   :  { %v614_v52 = vpop.permute.xlu2 %613 }
 0x396   :  { %v630_v49 = vmul.f32 %v614_v52, %v481_v7 }
 0x39d   :  { %v534_v54 = vpop.permute.xlu1 %533 }
 0x39e   :  { %v556_v41 = vmul.f32 %v534_v54, %v1632_v48  ;;  %v508_v55 = vpop.permute.xlu2 %507  ;;  %v636_v54 = vpack.c.bf16 %v630_v49, %v630_v49 }
 0x39f   :  { %v523_v4 = vmul.f32 %v508_v55, %v483_v33 }
 0x3a0   :  { %v562_v0 = vpack.c.bf16 %v556_v41, %v556_v41 }
 0x3a1   :  { %v529_v9 = vpack.c.bf16 %v523_v4, %v523_v4 }
 0x3a2   :  { %v667_v4 = vunpack.c.l.b16 %v562_v0 }
 0x3a3   :  { %v655_v14 = vunpack.c.l.b16 %v529_v9 }
 0x3a5   :  { %v498_v57 = vpop.permute.xlu0 %497 }
 0x3a6   :  { %v521_v46 = vmul.f32 %v498_v57, %v1638_v56 }
 0x3a7   :  { %v546_v1 = vpop.permute.xlu2 %545 }
 0x3a8   :  { %v527_v2 = vpack.c.bf16 %v521_v46, %v521_v46  ;;  %v559_v16 = vmul.f32 %v546_v1, %v483_v33  ;;  %v485_v1 = vpop.f32.mrf.mxu3 }
 0x3aa   :  { %v653_v3 = vunpack.c.l.b16 %v527_v2  ;;  %v565_v20 = vpack.c.bf16 %v559_v16, %v559_v16  ;;  %v699_v2 = vunpack.c.l.b16 %v636_v54  ;;  %v486_v16 = vadd.f32 %v485_v1, %v1579_v63 }
 0x3ac   :  { %v658_v6 = vpack.c.b16 %v653_v3, %v652_v61  ;;  %v670_v27 = vunpack.c.l.b16 %v565_v20 }
 0x3ae   :  { %v503_v8 = vpop.permute.xlu1 %502  ;;  %v578_v60 = vpop.permute.xlu0 %577 }
 0x3af   :  { %v522_v11 = vmul.f32 %v503_v8, %v481_v7  ;;  %v594_v29 = vmul.f32 %v578_v60, %v481_v7 }
 0x3b0   :  { %v586_v58 = vpop.permute.xlu2 %585 }
 0x3b1   :  { %v528_v13 = vpack.c.bf16 %v522_v11, %v522_v11  ;;  %v600_v37 = vpack.c.bf16 %v594_v29, %v594_v29 }
 0x3b3   :  { %v654_v15 = vunpack.c.l.b16 %v528_v13  ;;  %v684_v43 = vunpack.c.l.b16 %v600_v37 }
 0x3b5   :  { %v659_v17 = vpack.c.b16 %v655_v14, %v654_v15  ;;  %v487_v14 = vpop.f32.mrf.mxu3 }
 0x3b6   :  { %v488_v41 = vadd.f32 %v487_v14, %v1581_v21 }
 0x3b7   :  { %v542_v19 = vpop.permute.xlu1 %541 }
 0x3b8   :  { %v558_v22 = vmul.f32 %v542_v19, %v481_v7 }
 0x3b9   :  { %v622_v23 = vpop.permute.xlu2 %621 }
 0x3ba   :  { %v564_v24 = vpack.c.bf16 %v558_v22, %v558_v22  ;;  %v632_v29 = vmul.f32 %v622_v23, %v486_v16 }
 0x3bc   :  { %v669_v28 = vunpack.c.l.b16 %v564_v24 }
 0x3bd   :  { %v550_v13 = vpop.permute.xlu0 %549 }
 0x3be   :  { %v674_v59 = vpack.c.b16 %v670_v27, %v669_v28  ;;  %v560_v20 = vmul.f32 %v550_v13, %v486_v16  ;;  %v596_v28 = vmul.f32 %v586_v58, %v486_v16 }
 0x3c0   :  { %v582_v25 = vpop.permute.xlu1 %581  ;;  %v730_v35 = vsel %vm724_vm11, %v659_v17, %v674_v59  ;;  %v566_v59 = vpack.c.bf16 %v560_v20, %v560_v20 }
 0x3c1   :  { %v595_v38 = vmul.f32 %v582_v25, %v483_v33 }
 0x3c2   :  { %v518_v39 = vpop.permute.xlu2 %517 }
 0x3c3   :  { %v601_v40 = vpack.c.bf16 %v595_v38, %v595_v38  ;;  %v525_v60 = vmul.f32 %v518_v39, %v488_v41 }
 0x3c5   :  { %v685_v47 = vunpack.c.l.b16 %v601_v40  ;;  %v602_v40 = vpack.c.bf16 %v596_v28, %v596_v28 }
 0x3c6   :  { %v626_v19 = vpop.permute.xlu0 %625 }
 0x3c7   :  { %v689_v50 = vpack.c.b16 %v685_v47, %v684_v43  ;;  %v633_v24 = vmul.f32 %v626_v19, %v488_v41  ;;  %v638_v43 = vpack.c.bf16 %v632_v29, %v632_v29  ;;  %v671_v47 = vunpack.c.l.b16 %v566_v59 }
 0x3c8   :  { %v686_v54 = vunpack.c.l.b16 %v602_v40 }
 0x3c9   :  { %v618_v51 = vpop.permute.xlu1 %617  ;;  %v738_v53 = vsel %vm734_vm12, %v730_v35, %v689_v50  ;;  %v531_v35 = vpack.c.bf16 %v525_v60, %v525_v60  ;;  %v639_v37 = vpack.c.bf16 %v633_v24, %v633_v24 }
 0x3ca   :  { %v631_v55 = vmul.f32 %v618_v51, %v483_v33 }
 0x3cb   :  { %v538_v57 = vpop.permute.xlu2 %537  ;;  %v657_v51 = vunpack.c.l.b16 %v531_v35 }
 0x3cc   :  { %v637_v32 = vpack.c.bf16 %v631_v55, %v631_v55  ;;  %v557_v46 = vmul.f32 %v538_v57, %v1638_v56  ;;  %v701_v55 = vunpack.c.l.b16 %v638_v43 }
 0x3ce   :  { %v700_v61 = vunpack.c.l.b16 %v637_v32  ;;  %v563_v3 = vpack.c.bf16 %v557_v46, %v557_v46 }
 0x3d0   :  { %v704_v8 = vpack.c.b16 %v700_v61, %v699_v2  ;;  %v668_v52 = vunpack.c.l.b16 %v563_v3 }
 0x3d2   :  { %v673_v7 = vpack.c.b16 %v668_v52, %v667_v4  ;;  %v513_v9 = vpop.permute.xlu1 %512  ;;  %v746_v11 = vsel %vm741_vm13, %v738_v53, %v704_v8  ;;  %v702_v53 = vunpack.c.l.b16 %v639_v37  ;;  %v606_v8 = vpop.permute.xlu0 %605 }
 0x3d3   :  { %v524_v22 = vmul.f32 %v513_v9, %v486_v16  ;;  %v628_v13 = vmul.f32 %v606_v8, %v1632_v48 }
 0x3d4   :  { %v727_v33 = vsel %vm724_vm11, %v658_v6, %v673_v7  ;;  %v574_v49 = vpop.permute.xlu2 %573  ;;  %v705_v32 = vpack.c.b16 %v702_v53, %v701_v55 }
 0x3d5   :  { %v530_v25 = vpack.c.bf16 %v524_v22, %v524_v22  ;;  %v593_v58 = vmul.f32 %v574_v49, %v1638_v56  ;;  %v634_v16 = vpack.c.bf16 %v628_v13, %v628_v13 }
 0x3d7   :  { %v656_v63 = vunpack.c.l.b16 %v530_v25  ;;  %v599_v2 = vpack.c.bf16 %v593_v58, %v593_v58  ;;  %v697_v20 = vunpack.c.l.b16 %v634_v16 }
 0x3d9   :  { %v660_v57 = vpack.c.b16 %v657_v51, %v656_v63  ;;  %v683_v7 = vunpack.c.l.b16 %v599_v2 }
 0x3db   :  { %v554_v15 = vpop.permute.xlu1 %553 }
 0x3dc   :  { %v561_v17 = vmul.f32 %v554_v15, %v488_v41 }
 0x3de   :  { %v567_v27 = vpack.c.bf16 %v561_v17, %v561_v17 }
 0x3e0   :  { %v672_v6 = vunpack.c.l.b16 %v567_v27  ;;  %v641_v27 = vpack.c.bf16 %v1587_v10, %v1587_v10 }
 0x3e2   :  { %v675_v39 = vpack.c.b16 %v672_v6, %v671_v47 }
 0x3e4   :  { %v590_v38 = vpop.permute.xlu1 %589  ;;  %v733_v1 = vsel %vm724_vm11, %v660_v57, %v675_v39 }
 0x3e5   :  { %v597_v21 = vmul.f32 %v590_v38, %v488_v41 }
 0x3e7   :  { %v603_v50 = vpack.c.bf16 %v597_v21, %v597_v21 }
 0x3e9   :  { %v687_v23 = vunpack.c.l.b16 %v603_v50 }
 0x3eb   :  { %v690_v0 = vpack.c.b16 %v687_v23, %v686_v54 }
 0x3ec   :  { %v570_v46 = vpop.permute.xlu1 %569 }
 0x3ed   :  { %v592_v61 = vmul.f32 %v570_v46, %v1632_v48  ;;  %v740_v3 = vsel %vm734_vm12, %v733_v1, %v690_v0  ;;  %v640_v48 = vpack.c.bf16 %v1583_v5, %v1583_v5 }
 0x3ee   :  { %v749_v4 = vsel %vm741_vm13, %v740_v3, %v705_v32 }
 0x3ef   :  { %v598_v52 = vpack.c.bf16 %v592_v61, %v592_v61  ;;  %756 = vmatpush.bf16.msra.mxu1 %v749_v4 }
 0x3f1   :  { %v682_v9 = vunpack.c.l.b16 %v598_v52 }
 0x3f3   :  { %v688_v14 = vpack.c.b16 %v683_v7, %v682_v9  ;;  %757 = vmatpush.bf16.msra.mxu1 %v746_v11  ;;  %v712_v11 = vunpack.c.l.b16 %v640_v48 }
 0x3f5   :  { %v610_v41 = vpop.permute.xlu1 %609  ;;  %v736_v15 = vsel %vm734_vm12, %v727_v33, %v688_v14 }
 0x3f6   :  { %v629_v17 = vmul.f32 %v610_v41, %v1638_v56  ;;  %v713_v56 = vunpack.c.l.b16 %v641_v27  ;;  %v998_v27 = vld [vmem:[%s1830_s5 + $0x8] sm:$0xff] }
 0x3f8   :  { %v635_v19 = vpack.c.bf16 %v629_v17, %v629_v17  ;;  %v718_v33 = vpack.c.b16 %v713_v56, %v712_v11 }
 0x3fa   :  { %v698_v22 = vunpack.c.l.b16 %v635_v19 }
 0x3fc   :  { %v703_v60 = vpack.c.b16 %v698_v22, %v697_v20 }
 0x3fe   :  { %v743_v24 = vsel %vm741_vm13, %v736_v15, %v703_v60 }
 0x3ff   :  { %758 = vmatpush.bf16.msra.mxu1 %v743_v24 }
 0x402   :  { %1246 = vmatmul.msk.bf16.vlgmr.msra.gmra.mxu1 %vm362_vm10, %v1551_v42 }
 0x403   :  { %774 = vmatpush.bf16.msrb.mxu1 %v720_v36 }
 0x407   :  { %775 = vmatpush.bf16.msrb.mxu1 %v719_v34 }
 0x40b   :  { %776 = vmatpush.bf16.msrb.mxu1 %v718_v33 }
 0x412   :  { %1247 = vmatmul.msk.bf16.gmra.mxu1 %vm362_vm10, %v1557_v45 }
 0x422   :  { %1248 = vmatmul.msk.bf16.vlgmr.msrb.gmra.mxu1 %vm362_vm10, %v1551_v42 }
 0x432   :  { %1249 = vmatmul.msk.bf16.gmra.mxu1 %vm362_vm10, %v1557_v45 }
 0x47f   :  { %v1677_v5 = vpop.f32.mrf.mxu1 }
 0x487   :  { %v1679_v10 = vpop.f32.mrf.mxu1 }
 0x48f   :  { %v1681_v26 = vpop.f32.mrf.mxu1 }
 0x497   :  { %v767_v30 = vpop.f32.mrf.mxu1 }
 0x49f   :  { %v778_v31 = vpop.f32.mrf.mxu1 }
 0x4a0   :  { %vm787_vm14 = vcmp.gt.f32.partialorder %v778_v31, 0.0 }
 0x4a1   :  { %v790_v34 = vsel %vm787_vm14, %v778_v31, 1.0  ;;  %v997_v31 = vld [vmem:[%s1830_s5] sm:$0xff] }
 0x4a2   :  { %1324 = vrcp.f32 %v790_v34  ;;  %v804_v29 = vand.u32 2147483648, %v790_v34  ;;  %v802_v25 = vand.u32 2147483647, %v790_v34  ;;  %vm798_vm1 = vweird.f32 %v790_v34 }
 0x4a4   :  { %v805_v38 = vor.u32 1.1754944e-38, %v804_v29  ;;  %vm803_vm5 = vcmp.eq.f32.partialorder %v802_v25, 8.507059e+37 }
 0x4a7   :  { %v780_v44 = vpop.f32.mrf.mxu1 }
 0x4a8   :  { %v1325_v36 = vpop.eup %1324  ;;  %vm788_vm15 = vcmp.gt.f32.partialorder %v780_v44, 0.0 }
 0x4a9   :  { %v794_v28 = vmul.f32 %v1325_v36, %v790_v34  ;;  %v791_v42 = vsel %vm788_vm15, %v780_v44, 1.0  ;;  %vm799_vm0 = vweird.f32 %v1325_v36  ;;  %v85_v34 = vld [vmem:[%s1834_s9 + $0x8] sm:$0x7] }
 0x4aa   :  { %1326 = vrcp.f32 %v791_v42  ;;  %vm800_vm3 = vmor %vm798_vm1, %vm799_vm0  ;;  %v819_v50 = vand.u32 2147483648, %v791_v42  ;;  %v817_v53 = vand.u32 2147483647, %v791_v42  ;;  %vm813_vm7 = vweird.f32 %v791_v42 }
 0x4ab   :  { %v795_v45 = vsub.f32 1.0, %v794_v28  ;;  %vm1000_vm1 = vcmp.eq.s32.totalorder %v997_v31, 0  ;;  %v999_v28 = vld [vmem:[%s1830_s5 + $0x10] sm:$0xff] }
 0x4ac   :  { %v820_v23 = vor.u32 1.1754944e-38, %v819_v50  ;;  %vm818_vm9 = vcmp.eq.f32.partialorder %v817_v53, 8.507059e+37  ;;  %v1003_v44 = vsel %vm1000_vm1, 1, %v1360_v62  ;;  %v1737_v53 = vld [vmem:[%s1834_s9] sm:$0xff] }
 0x4ad   :  { %v796_v59 = vmul.f32 %v1325_v36, %v795_v45 }
 0x4af   :  { %v797_v35 = vadd.f32 %v1325_v36, %v796_v59  ;;  %v783_v37 = vpop.f32.mrf.mxu1 }
 0x4b0   :  { %v1327_v6 = vpop.eup %1326  ;;  %vm789_vm4 = vcmp.gt.f32.partialorder %v783_v37, 0.0 }
 0x4b1   :  { %v801_v40 = vsel %vm800_vm3, %v1325_v36, %v797_v35  ;;  %v809_v21 = vmul.f32 %v1327_v6, %v791_v42  ;;  %v792_v43 = vsel %vm789_vm4, %v783_v37, 1.0  ;;  %vm814_vm6 = vweird.f32 %v1327_v6 }
 0x4b2   :  { %v806_v47 = vsel %vm803_vm5, %v805_v38, %v801_v40  ;;  %1328 = vrcp.f32 %v792_v43  ;;  %vm815_vm8 = vmor %vm813_vm7, %vm814_vm6  ;;  %v834_v1 = vand.u32 2147483648, %v792_v43  ;;  %vm828_vm10 = vweird.f32 %v792_v43 }
 0x4b3   :  { %v838_v63 = vsel %vm787_vm14, %v806_v47, 0.0  ;;  %v810_v49 = vsub.f32 1.0, %v809_v21  ;;  %v832_v61 = vand.u32 2147483647, %v792_v43  ;;  %vm1033_vm3 = vcmp.eq.s32.totalorder %v998_v27, 1 }
 0x4b4   :  { %860 = vperm.xlu0 %1302, %v838_v63   ;;  %v835_v4 = vor.u32 1.1754944e-38, %v834_v1  ;;  %v1036_v36 = vsel %vm1033_vm3, 1, %v1360_v62  ;;  %vm1065_vm5 = vcmp.eq.s32.totalorder %v998_v27, 2  ;;  %vm1002_vm6 = vcmp.eq.s32.totalorder %v999_v28, 0 }
 0x4b5   :  { %v811_v51 = vmul.f32 %v1327_v6, %v810_v49  ;;  %vm833_vm0 = vcmp.eq.f32.partialorder %v832_v61, 8.507059e+37  ;;  %v1068_v45 = vsel %vm1065_vm5, 1, %v1360_v62  ;;  %v1005_v29 = vsel %vm1002_vm6, 1, %v1360_v62 }
 0x4b6   :  { %vm1064_vm7 = vcmp.eq.s32.totalorder %v997_v31, 2  ;;  %vm1096_vm6 = vcmask 1040384  }
 0x4b7   :  { %v812_v39 = vadd.f32 %v1327_v6, %v811_v51  ;;  %v785_v54 = vpop.f32.mrf.mxu1  ;;  %v1067_v59 = vsel %vm1064_vm7, 1, %v1360_v62  ;;  %vm1098_vm7 = vcmask 1041408  }
 0x4b8   :  { %v1329_v58 = vpop.eup %1328 }
 0x4b9   :  { %v816_v55 = vsel %vm815_vm8, %v1327_v6, %v812_v39  ;;  %v824_v57 = vmul.f32 %v1329_v58, %v792_v43  ;;  %vm829_vm13 = vweird.f32 %v1329_v58  ;;  %vm1066_vm8 = vcmp.eq.s32.totalorder %v999_v28, 2 }
 0x4ba   :  { %v821_v0 = vsel %vm818_vm9, %v820_v23, %v816_v55  ;;  %vm830_vm14 = vmor %vm828_vm10, %vm829_vm13  ;;  %vm1100_vm9 = vcmp.gt.f32.partialorder %v85_v34, 0.0  ;;  %v1069_v25 = vsel %vm1066_vm8, 1, %v1360_v62  ;;  %vm1034_vm10 = vcmp.eq.s32.totalorder %v999_v28, 1 }
 0x4bb   :  { %v839_v32 = vsel %vm788_vm15, %v821_v0, 0.0  ;;  %v825_v46 = vsub.f32 1.0, %v824_v57  ;;  %vm1001_vm15 = vcmp.eq.s32.totalorder %v998_v27, 0  ;;  %v1101_v35 = vsel %vm1100_vm9, 1, %v1360_v62 }
 0x4bc   :  { %1308 = vset.pattern.permute.xlu0 %v1362_v12  ;;  %864 = vperm.xlu1 %1303, %v839_v32   ;;  %v1004_v30 = vsel %vm1001_vm15, 1, %v1360_v62  ;;  %v1037_v37 = vsel %vm1034_vm10, 1, %v1360_v62  ;;  %vm1187_vm9 = vcmask 2048  }
 0x4bd   :  { %v826_v2 = vmul.f32 %v1329_v58, %v825_v46  ;;  %920 = vperm.xlu0 %1308, %v838_v63  }
 0x4bf   :  { %v827_v3 = vadd.f32 %v1329_v58, %v826_v2 }
 0x4c1   :  { %v831_v8 = vsel %vm830_vm14, %v1329_v58, %v827_v3  ;;  %v952_v58 = vperm.slane %v1737_v53, 0  ;;  %v963_v3 = vperm.slane %v1737_v53, 2 }
 0x4c2   :  { %v836_v52 = vsel %vm833_vm0, %v835_v4, %v831_v8 }
 0x4c3   :  { %v840_v7 = vsel %vm789_vm4, %v836_v52, 0.0  ;;  %vm1032_vm4 = vcmp.eq.s32.totalorder %v997_v31, 1  ;;  %v967_v31 = vld [vmem:[%s1829_s4] sm:$0x7] }
 0x4c4   :  { %1304 = vset.pattern.permute.xlu1 %v1363_v18  ;;  %868 = vperm.xlu2 %1305, %v840_v7   ;;  %v1035_v42 = vsel %vm1032_vm4, 1, %v1360_v62 }
 0x4c5   :  { %894 = vperm.xlu1 %1304, %v839_v32   ;;  %1311 = vset.pattern.permute.xlu0 %v1360_v62 }
 0x4cc   :  { %1306 = vset.pattern.permute.xlu2 %v1363_v18 }
 0x4cd   :  { %890 = vperm.xlu1 %1304, %v838_v63   ;;  %898 = vperm.xlu2 %1306, %v840_v7  }
 0x4d5   :  { %1310 = vset.pattern.permute.xlu1 %v1360_v62  ;;  %1307 = vset.pattern.permute.xlu2 %v1362_v12 }
 0x4d6   :  { %853 = vperm.xlu1 %1310, %v840_v7   ;;  %928 = vperm.xlu2 %1307, %v840_v7  }
 0x4de   :  { %924 = vperm.xlu2 %1307, %v839_v32  }
 0x4e6   :  { %1309 = vset.pattern.permute.xlu2 %v1360_v62 }
 0x4e7   :  { %848 = vperm.xlu2 %1309, %v839_v32  }
 0x4ef   :  { %843 = vperm.xlu2 %1309, %v838_v63  }
 0x51e   :  { %v869_v9 = vpop.permute.xlu2 %868 }
 0x51f   :  { %v873_v13 = vmul.f32 %v869_v9, %v1681_v26 }
 0x521   :  { %881 = vrot.lane.b32.xlu1 %v873_v13, %s1364_s6 }
 0x526   :  { %v861_v14 = vpop.permute.xlu0 %860 }
 0x527   :  { %v871_v18 = vmul.f32 %v861_v14, %v1677_v5  ;;  %v899_v41 = vpop.permute.xlu2 %898 }
 0x528   :  { %v903_v15 = vmul.f32 %v899_v41, %v1681_v26 }
 0x529   :  { %877 = vrot.lane.b32.xlu2 %v871_v18, %s1364_s6 }
 0x52a   :  { %911 = vrot.lane.b32.xlu1 %v903_v15, %s1357_s22 }
 0x52e   :  { %v865_v12 = vpop.permute.xlu1 %864 }
 0x52f   :  { %v872_v16 = vmul.f32 %v865_v12, %v1679_v10  ;;  %v921_v20 = vpop.permute.xlu0 %920 }
 0x530   :  { %v929_v17 = vpop.permute.xlu2 %928  ;;  %v931_v24 = vmul.f32 %v921_v20, %v1677_v5 }
 0x531   :  { %v933_v19 = vmul.f32 %v929_v17, %v1681_v26  ;;  %879 = vrot.lane.b32.xlu0 %v872_v16, %s1364_s6 }
 0x533   :  { %941 = vrot.lane.b32.xlu1 %v933_v19, %s1365_s8 }
 0x537   :  { %v895_v22 = vpop.permute.xlu1 %894 }
 0x538   :  { %v902_v60 = vmul.f32 %v895_v22, %v1679_v10  ;;  %v925_v48 = vpop.permute.xlu2 %924 }
 0x539   :  { %v932_v11 = vmul.f32 %v925_v48, %v1679_v10 }
 0x53a   :  { %909 = vrot.lane.b32.xlu0 %v902_v60, %s1357_s22 }
 0x53b   :  { %937 = vrot.lane.b32.xlu1 %v931_v24, %s1365_s8 }
 0x53f   :  { %v891_v56 = vpop.permute.xlu1 %890 }
 0x540   :  { %v901_v33 = vmul.f32 %v891_v56, %v1677_v5 }
 0x541   :  { %v849_v6 = vpop.permute.xlu2 %848 }
 0x542   :  { %907 = vrot.lane.b32.xlu2 %v901_v33, %s1357_s22  ;;  %939 = vrot.lane.b32.xlu0 %v932_v11, %s1365_s8  ;;  %v857_v7 = vmul.f32 %v849_v6, %v1679_v10 }
 0x543   :  { %1010 = vperm.xlu1 %1310, %v1004_v30  }
 0x548   :  { %v854_v38 = vpop.permute.xlu1 %853 }
 0x549   :  { %v844_v40 = vpop.permute.xlu2 %843  ;;  %v858_v49 = vmul.f32 %v854_v38, %v1681_v26  ;;  %v959_v26 = vperm.slane %v1737_v53, 1 }
 0x54a   :  { %993 = vperm.xlu2 %1309, %v85_v34   ;;  %1007 = vperm.xlu0 %1311, %v1003_v44   ;;  %v856_v55 = vmul.f32 %v844_v40, %v1677_v5 }
 0x54b   :  { %1042 = vperm.xlu1 %1310, %v1036_v36  }
 0x552   :  { %1039 = vperm.xlu2 %1309, %v1035_v42   ;;  %1074 = vperm.xlu0 %1311, %v1068_v45  }
 0x553   :  { %1013 = vperm.xlu1 %1310, %v1005_v29  }
 0x55a   :  { %1071 = vperm.xlu2 %1309, %v1067_v59   ;;  %1077 = vperm.xlu0 %1311, %v1069_v25  }
 0x55b   :  { %1103 = vperm.xlu1 %1310, %v1101_v35  }
 0x562   :  { %1045 = vperm.xlu2 %1309, %v1037_v37  }
 0x583   :  { %v878_v43 = vpop.permute.xlu2 %877 }
 0x584   :  { %v886_v0 = vadd.f32 %v878_v43, %v856_v55 }
 0x593   :  { %v882_v21 = vpop.permute.xlu1 %881 }
 0x594   :  { %v888_v50 = vadd.f32 %v882_v21, %v858_v49 }
 0x59c   :  { %v912_v47 = vpop.permute.xlu1 %911  ;;  %v908_v63 = vpop.permute.xlu2 %907 }
 0x59d   :  { %v918_v39 = vadd.f32 %v912_v47, %v888_v50  ;;  %v916_v46 = vadd.f32 %v908_v63, %v886_v0 }
 0x5a3   :  { %v880_v51 = vpop.permute.xlu0 %879 }
 0x5a4   :  { %v1739_v54 = vpop.permute.xlu2 %993  ;;  %v887_v5 = vadd.f32 %v880_v51, %v857_v7 }
 0x5a5   :  { %v942_v62 = vpop.permute.xlu1 %941 }
 0x5a6   :  { %v948_v23 = vadd.f32 %v942_v62, %v918_v39 }
 0x5a8   :  { %v951_v57 = vmul.f32 0.25, %v948_v23 }
 0x5aa   :  { %v955_v32 = vadd.f32 %v952_v58, %v951_v57 }
 0x5ac   :  { %v958_v1 = vmax.f32 %v955_v32, 0.0  ;;  %v910_v2 = vpop.permute.xlu0 %909  ;;  %v1040_v61 = vpop.permute.xlu2 %1039 }
 0x5ad   :  { %v938_v4 = vpop.permute.xlu1 %937  ;;  %v917_v18 = vadd.f32 %v910_v2, %v887_v5  ;;  %vm1047_vm14 = vcmp.eq.s32.totalorder %v1040_v61, 1 }
 0x5ae   :  { %v962_v8 = vmul.f32 %v959_v26, %v958_v1  ;;  %v946_v52 = vadd.f32 %v938_v4, %v916_v46 }
 0x5b0   :  { %v949_v9 = vmul.f32 0.25, %v946_v52  ;;  %v1746_v13 = vadd.f32 %v963_v3, %v962_v8 }
 0x5b2   :  { %v953_v14 = vadd.f32 %v952_v58, %v949_v9  ;;  %984 = vmatpush.msra.mxu2 %v1746_v13 }
 0x5b4   :  { %v956_v41 = vmax.f32 %v953_v14, 0.0  ;;  %v940_v15 = vpop.permute.xlu0 %939  ;;  %v1072_v12 = vpop.permute.xlu2 %1071 }
 0x5b5   :  { %v947_v16 = vadd.f32 %v940_v15, %v917_v18  ;;  %v1011_v17 = vpop.permute.xlu1 %1010  ;;  %vm1079_vm3 = vcmp.eq.s32.totalorder %v1072_v12, 1  ;;  %v1118_v12 = vld [vmem:[%s1835_s10 + $0x30] sm:$0xff] }
 0x5b6   :  { %v960_v19 = vmul.f32 %v959_v26, %v956_v41  ;;  %vm1016_vm15 = vcmp.eq.s32.totalorder %v1011_v17, 1  ;;  %v1116_v17 = vld [vmem:[%s1835_s10 + $0x20] sm:$0xff] }
 0x5b7   :  { %v950_v20 = vmul.f32 0.25, %v947_v16  ;;  %v1117_v16 = vld [vmem:[%s1835_s10 + $0x28] sm:$0xff] }
 0x5b8   :  { %v964_v60 = vadd.f32 %v963_v3, %v960_v19  ;;  %v1115_v19 = vld [vmem:[%s1835_s10 + $0x18] sm:$0xff] }
 0x5b9   :  { %v954_v22 = vadd.f32 %v952_v58, %v950_v20  ;;  %v1114_v20 = vld [vmem:[%s1835_s10 + $0x10] sm:$0xff] }
 0x5ba   :  { %v1050_v30 = vsel %vm1047_vm14, %v964_v60, -1e+30  ;;  %v1082_v35 = vsel %vm1079_vm3, %v964_v60, -1e+30 }
 0x5bb   :  { %v957_v24 = vmax.f32 %v954_v22, 0.0  ;;  %v1053_v45 = vsel %vm724_vm11, %v1050_v30, -inf  ;;  %v1085_v43 = vsel %vm724_vm11, %v1082_v35, -inf  ;;  %v1113_v22 = vld [vmem:[%s1835_s10 + $0x8] sm:$0xff] }
 0x5bc   :  { %v1008_v27 = vpop.permute.xlu0 %1007  ;;  %v1046_v10 = vpop.permute.xlu2 %1045 }
 0x5bd   :  { %v961_v48 = vmul.f32 %v959_v26, %v957_v24  ;;  %vm1015_vm13 = vcmp.eq.s32.totalorder %v1008_v27, 1  ;;  %v1043_v56 = vpop.permute.xlu1 %1042  ;;  %vm1049_vm0 = vcmp.eq.s32.totalorder %v1046_v10, 1  ;;  %v1112_v27 = vld [vmem:[%s1835_s10] sm:$0xff]  ;;  %v1259_v10 = vld [vmem:[%s1835_s10 + $0x78] sm:$0xff] }
 0x5be   :  { %v1018_v33 = vsel %vm1015_vm13, %v964_v60, -1e+30  ;;  %vm1048_vm1 = vcmp.eq.s32.totalorder %v1043_v56, 1  ;;  %v1052_v44 = vsel %vm1049_vm0, %v1746_v13, -1e+30  ;;  %v1256_v56 = vld [vmem:[%s1835_s10 + $0x60] sm:$0xff] }
 0x5bf   :  { %v965_v11 = vadd.f32 %v963_v3, %v961_v48  ;;  %v1021_v42 = vsel %vm724_vm11, %v1018_v33, -inf  ;;  %v1055_v37 = vsel %vm724_vm11, %v1052_v44, -inf  ;;  %v1258_v48 = vld [vmem:[%s1835_s10 + $0x70] sm:$0xff] }
 0x5c0   :  { %v1254_v44 = vld [vmem:[%s1835_s10 + $0x50] sm:$0xff] }
 0x5c1   :  { %v1019_v34 = vsel %vm1016_vm15, %v965_v11, -1e+30  ;;  %v1051_v36 = vsel %vm1048_vm1, %v965_v11, -1e+30  ;;  %985 = vmatpush.msra.mxu2 %v965_v11 }
 0x5c2   :  { %v1022_v28 = vsel %vm724_vm11, %v1019_v34, -inf  ;;  %v1054_v29 = vsel %vm724_vm11, %v1051_v36, -inf  ;;  %v1253_v36 = vld [vmem:[%s1835_s10 + $0x48] sm:$0xff] }
 0x5c3   :  { %v1024_v59 = vmax.f32 %v1021_v42, %v1022_v28  ;;  %v1056_v25 = vmax.f32 %v1053_v45, %v1054_v29  ;;  %986 = vmatpush.msra.mxu2 %v964_v60  ;;  %v1252_v28 = vld [vmem:[%s1835_s10 + $0x40] sm:$0xff]  ;;  %v1120_v42 = vperm.slane %v1737_v53, 3 }
 0x5c4   :  { %v1075_v6 = vpop.permute.xlu0 %1074  ;;  %1250 = vmatmul.msk.f32.vlgmr.msra.gmra.mxu2 %vm236_vm2, %v967_v31 }
 0x5c5   :  { %v1057_v38 = vmax.f32 %v1056_v25, %v1055_v37  ;;  %vm1080_vm4 = vcmp.eq.s32.totalorder %v1075_v6, 1  ;;  %v1014_v40 = vpop.permute.xlu1 %1013  ;;  %1166 = vmatpush.msrb.mxu2 %v1259_v10  ;;  %v1154_v25 = vperm.slane %v1737_v53, 4  ;;  %v1179_v6 = vperm.slane %v1737_v53, 5 }
 0x5c6   :  { %v1083_v21 = vsel %vm1080_vm4, %v965_v11, -1e+30  ;;  %vm1017_vm5 = vcmp.eq.s32.totalorder %v1014_v40, 1  ;;  %v1255_v11 = vld [vmem:[%s1835_s10 + $0x58] sm:$0xff] }
 0x5c7   :  { %v1058_v47 = vrot.slane %v1057_v38, 4  ;;  %v1086_v63 = vsel %vm724_vm11, %v1083_v21, -inf  ;;  %v1020_v49 = vsel %vm1017_vm5, %v1746_v13, -1e+30  ;;  %1167 = vmatpush.msrb.mxu2 %v1258_v48 }
 0x5c8   :  { %v1088_v50 = vmax.f32 %v1085_v43, %v1086_v63  ;;  %v1023_v51 = vsel %vm724_vm11, %v1020_v49, -inf  ;;  %v1185_v43 = vperm.slane %v1737_v53, 6 }
 0x5c9   :  { %v1059_v39 = vmax.f32 %v1057_v38, %v1058_v47  ;;  %v1025_v62 = vmax.f32 %v1024_v59, %v1023_v51 }
 0x5cb   :  { %v1060_v58 = vrot.slane %v1059_v39, 2  ;;  %v1026_v23 = vrot.slane %v1025_v62, 4 }
 0x5cc   :  { %v1078_v55 = vpop.permute.xlu0 %1077 }
 0x5cd   :  { %v1061_v57 = vmax.f32 %v1059_v39, %v1060_v58  ;;  %v1027_v0 = vmax.f32 %v1025_v62, %v1026_v23  ;;  %vm1081_vm2 = vcmp.eq.s32.totalorder %v1078_v55, 1  ;;  %v1104_v33 = vpop.permute.xlu1 %1103 }
 0x5ce   :  { %v1084_v26 = vsel %vm1081_vm2, %v1746_v13, -1e+30  ;;  %v1119_v13 = vld [vmem:[%s1835_s10 + $0x38] sm:$0xff]  ;;  %vm1105_vm8 = vcmp.eq.s32.totalorder %v1104_v33, 1 }
 0x5cf   :  { %v1028_v32 = vrot.slane %v1027_v0, 2  ;;  %v1087_v46 = vsel %vm724_vm11, %v1084_v26, -inf  ;;  %v1062_v61 = vrot.slane %v1061_v57, 1  ;;  %1132 = vmatpush.msrb.mxu3 %v1119_v13 }
 0x5d0   :  { %v1089_v1 = vmax.f32 %v1088_v50, %v1087_v46 }
 0x5d1   :  { %v1029_v2 = vmax.f32 %v1027_v0, %v1028_v32  ;;  %v1063_v7 = vmax.f32 %v1061_v57, %v1062_v61  ;;  %1133 = vmatpush.msrb.mxu3 %v1118_v12 }
 0x5d2   :  { %v1090_v3 = vrot.slane %v1089_v1, 4 }
 0x5d3   :  { %v1030_v4 = vrot.slane %v1029_v2, 1  ;;  %1134 = vmatpush.msrb.mxu3 %v1117_v16 }
 0x5d4   :  { %v1091_v8 = vmax.f32 %v1089_v1, %v1090_v3 }
 0x5d5   :  { %v1031_v52 = vmax.f32 %v1029_v2, %v1030_v4  ;;  %1135 = vmatpush.msrb.mxu3 %v1116_v17 }
 0x5d6   :  { %v1092_v9 = vrot.slane %v1091_v8, 2 }
 0x5d7   :  { %v1097_v5 = vsel %vm1096_vm6, %v1031_v52, %v1063_v7  ;;  %1136 = vmatpush.msrb.mxu3 %v1115_v19 }
 0x5d8   :  { %v1093_v14 = vmax.f32 %v1091_v8, %v1092_v9 }
 0x5d9   :  { %1137 = vmatpush.msrb.mxu3 %v1114_v20 }
 0x5da   :  { %v1094_v18 = vrot.slane %v1093_v14, 1 }
 0x5db   :  { %1138 = vmatpush.msrb.mxu3 %v1113_v22 }
 0x5dc   :  { %v1095_v41 = vmax.f32 %v1093_v14, %v1094_v18 }
 0x5dd   :  { %1139 = vmatpush.msrb.mxu3 %v1112_v27 }
 0x5de   :  { %v1099_v15 = vsel %vm1098_vm7, %v1097_v5, %v1095_v41 }
 0x5df   :  { %v1106_v30 = vsel %vm1105_vm8, %v1099_v15, 0.0 }
 0x647   :  { %v988_v60 = vpop.f32.mrf.mxu2 }
 0x648   :  { %v996_v24 = vmul.f32 %v1739_v54, %v988_v60  ;;  %v1257_v54 = vld [vmem:[%s1835_s10 + $0x68] sm:$0xff] }
 0x649   :  { %1168 = vmatpush.msrb.mxu2 %v1257_v54 }
 0x64a   :  { %1108 = vrot.lane.b32.xlu2 %v996_v24, %s1365_s8 }
 0x64b   :  { %1169 = vmatpush.msrb.mxu2 %v1256_v56 }
 0x64d   :  { %1170 = vmatpush.msrb.mxu2 %v1255_v11 }
 0x64f   :  { %1171 = vmatpush.msrb.mxu2 %v1254_v44 }
 0x651   :  { %1172 = vmatpush.msrb.mxu2 %v1253_v36 }
 0x653   :  { %1173 = vmatpush.msrb.mxu2 %v1252_v28 }
 0x6a4   :  { %v1109_v31 = vpop.permute.xlu2 %1108 }
 0x6a5   :  { %v1111_v34 = vsel %vm724_vm11, %v1106_v30, %v1109_v31  ;;  %vm1181_vm11 = vcmask 518144  }
 0x6a6   :  { %1251 = vmatmul.msk.f32.vlgmr.msrb.gmra.mxu3 %vm734_vm12, %v1111_v34 }
 0x729   :  { %v1141_v45 = vpop.f32.mrf.mxu3 }
 0x72a   :  { %v1142_v29 = vadd.f32 %v1141_v45, %v1120_v42 }
 0x72c   :  { %v1144_v59 = vmax.f32 %v1142_v29, 0.0 }
 0x72e   :  { %1260 = vmatmul.msk.f32.vlgmr.msrb.gmra.mxu2 %vm734_vm12, %v1144_v59 }
 0x7b1   :  { %v1175_v35 = vpop.f32.mrf.mxu2 }
 0x7b2   :  { %v1176_v37 = vadd.f32 %v1175_v35, %v1154_v25 }
 0x7b4   :  { %v1178_v38 = vmax.f32 %v1176_v37, 0.0 }
 0x7b6   :  { %v1180_v40 = vmul.f32 %v1179_v6, %v1178_v38 }
 0x7b8   :  { %v1182_v21 = vsel %vm1181_vm11, %v1180_v40, 0.0 }
 0x7b9   :  { %1183 = vadd.xlane.f32.xlu0 %v1182_v21 }
 0x82c   :  { %v1184_v47 = vpop.xlane.xlu0 %1183 }
 0x82d   :  { %v1186_v63 = vadd.f32 %v1185_v43, %v1184_v47 }
 0x82f   :  { %1188 = vst.msk [vmem:[%s1836_s11] sm:$0x7] %vm1187_vm9, %v1186_v63 }
 0x830   :  { %1193 = vsyncpa [#allocation3], 1 }

</bundles_post_ra>
